<compile_context>
chip_gen: v5e
topology: v5e:2x2
jax: 0.10.0
libtpu: 0.0.40
codegen_flags: <defaults>
</compile_context>

<pallas_src>
import functools
import math

import jax
import jax.numpy as jnp
from jax.experimental import pallas as pl
from jax.experimental.pallas import tpu as pltpu


# ----------------------------------------------------------------------------------
# Kernels
# ----------------------------------------------------------------------------------
def _projection_kernel(x_ref, w_ref, a_ref, h_ref, f_ref):
    """h = x @ W_all (all heads batched, bf16 MXU, f32 acc);
    f = h @ [A_src_bd | A_dst_bd] -> (TM, 2H) per-head attention scalars (one merged output)."""
    h = jnp.dot(x_ref[...], w_ref[...], preferred_element_type=jnp.float32)   # (TM, H*D) f32
    f_ref[...] = jnp.dot(h, a_ref[...], preferred_element_type=jnp.float32)   # (TM, 2H)
    h_ref[...] = h.astype(h_ref.dtype)                                        # bf16 copy for e@h


def _attention_kernel(adj_ref, h_ref, fsrc_ref, fdstt_ref, out_ref, acc_ref, *,
                      alpha, nheads, nhid, apply_log_softmax):
    """Grid = (query strips ["parallel"], key tiles ["arbitrary"]).
    acc_ref (TM, H*(D+1)) f32 accumulates per-head [aggregation | rowsum] across key tiles."""
    kstep = pl.program_id(1)

    @pl.when(kstep == 0)
    def _init():
        acc_ref[...] = jnp.zeros_like(acc_ref)

    mask = adj_ref[...] != 0                          # (TM, TK) bool, straight from int8
    keys = h_ref[...]                                 # (TK, H*(D+1)) bf16, ones col per head
    fsrc = fsrc_ref[...]                              # (TM, H) f32
    fdst = fdstt_ref[...]                             # (H, TK) f32
    daug = nhid + 1

    partials = []
    for hd in range(nheads):
        z = fsrc[:, hd:hd + 1] + fdst[hd:hd + 1, :]   # (TM, TK) scores
        z = jnp.where(z > 0, z, alpha * z)            # LeakyReLU(alpha)
        e = jnp.where(mask, jnp.exp(-z), 0.0)         # masked exp(-lrelu), f32
        # e @ [h_k | 1]: aggregation and rowsum in a single MXU pass (f32 accumulation).
        partials.append(jnp.dot(e.astype(jnp.bfloat16),
                                keys[:, hd * daug:(hd + 1) * daug],
                                preferred_element_type=jnp.float32))          # (TM, D+1)
    # Single lane-dense accumulate per step (no narrow per-head column stores).
    acc_ref[...] += jnp.concatenate(partials, axis=-1)

    @pl.when(kstep == pl.num_programs(1) - 1)
    def _finalize():
        acc = acc_ref[...]
        outs = []
        for hd in range(nheads):
            blk = acc[:, hd * daug:(hd + 1) * daug]
            # NOTE: rowsum == 0 (node without incident edges) gives NaN, exactly like the
            # pyGAT reference (0/0); callers are expected to provide self-loops.
            hp = blk[:, :nhid] / blk[:, nhid:daug]                            # agg / rowsum
            outs.append(jnp.where(hp > 0, hp, jnp.exp(hp) - 1.0))             # ELU
        y = outs[0] if nheads == 1 else jnp.concatenate(outs, axis=-1)        # (TM, H*D)
        if apply_log_softmax:                                                 # log_softmax(dim=1)
            m = jnp.max(y, axis=-1, keepdims=True)
            s = y - m
            y = s - jnp.log(jnp.sum(jnp.exp(s), axis=-1, keepdims=True))
        out_ref[...] = y                                                      # one dense store


# ----------------------------------------------------------------------------------
# Wrappers
# ----------------------------------------------------------------------------------
def _round_up(x, m):
    return ((x + m - 1) // m) * m


def _grid_plan(n, row_tile, key_tile):
    """Return (n_pad, tm, tk) with tm | n_pad, tk | n_pad and Mosaic-legal tile shapes.
    Small graphs -> single full-size strip (multiple of 8); large graphs -> fixed tiles
    and N padded up to a multiple of lcm(tm, tk)."""
    if n <= row_tile:
        n_pad = _round_up(n, 8)
        return n_pad, n_pad, n_pad
    base = (row_tile * key_tile) // math.gcd(row_tile, key_tile)
    return _round_up(n, base), row_tile, key_tile


def _block_diag_heads(a):
    """a: (H, D) per-head attention vectors -> (H*D, H) block-diagonal matrix so that
    (x @ W_all) @ A has column h equal to a_h · h_i^{(h)}."""
    H, D = a.shape
    eye = jnp.eye(H, dtype=a.dtype)
    return (a[:, :, None] * eye[:, None, :]).reshape(H * D, H)


def _augment_keys(h, nheads, nhid):
    """Append a ones column per head: (N, H*D) -> (N, H*(D+1)) so e@keys gives agg+rowsum."""
    n = h.shape[0]
    h3 = h.reshape(n, nheads, nhid)
    ones = jnp.ones((n, nheads, 1), dtype=h.dtype)
    return jnp.concatenate([h3, ones], axis=-1).reshape(n, nheads * (nhid + 1))


def _projection(x, w_all, a_src, a_dst, *, tm):
    n, nfeat = x.shape
    hd = w_all.shape[1]
    nh = a_src.shape[0]
    a_cat = jnp.concatenate([_block_diag_heads(a_src), _block_diag_heads(a_dst)], axis=1)

    return pl.pallas_call(
        _projection_kernel,
        out_shape=(
            jax.ShapeDtypeStruct((n, hd), jnp.bfloat16),      # projected features (matmul operand)
            jax.ShapeDtypeStruct((n, 2 * nh), jnp.float32),   # [f_src | f_dst] merged
        ),
        grid=(n // tm,),
        in_specs=[
            pl.BlockSpec((tm, nfeat), lambda i: (i, 0)),      # x row strip (bf16)
            pl.BlockSpec((nfeat, hd), lambda i: (0, 0)),      # W_all (shared, bf16)
            pl.BlockSpec((hd, 2 * nh), lambda i: (0, 0)),     # [A_src_bd | A_dst_bd] (shared)
        ],
        out_specs=(
            pl.BlockSpec((tm, hd), lambda i: (i, 0)),
            pl.BlockSpec((tm, 2 * nh), lambda i: (i, 0)),
        ),
        compiler_params=pltpu.CompilerParams(dimension_semantics=("parallel",)),
    )(x.astype(jnp.bfloat16), w_all.astype(jnp.bfloat16), a_cat)


def _attention(adj_mask, h_aug, fsrc, fdstt, *, alpha, nheads, nhid,
               apply_log_softmax, tm, tk):
    n = adj_mask.shape[0]
    hd = nheads * nhid
    hda = nheads * (nhid + 1)

    return pl.pallas_call(
        functools.partial(_attention_kernel, alpha=alpha, nheads=nheads, nhid=nhid,
                          apply_log_softmax=apply_log_softmax),
        out_shape=jax.ShapeDtypeStruct((n, hd), jnp.float32),
        grid=(n // tm, n // tk),
        in_specs=[
            pl.BlockSpec((tm, tk), lambda i, k: (i, k)),       # int8 adjacency tile
            pl.BlockSpec((tk, hda), lambda i, k: (k, 0)),      # bf16 augmented keys tile
            pl.BlockSpec((tm, nheads), lambda i, k: (i, 0)),   # f_src rows for this strip
            pl.BlockSpec((nheads, tk), lambda i, k: (0, k)),   # f_dst for this key tile
        ],
        out_specs=pl.BlockSpec((tm, hd), lambda i, k: (i, 0)), # head-concatenated strip
        scratch_shapes=[pltpu.VMEM((tm, hda), jnp.float32)],   # [agg | rowsum] accumulator
        compiler_params=pltpu.CompilerParams(
            dimension_semantics=("parallel", "arbitrary")),
    )(adj_mask, h_aug, fsrc, fdstt)


def spgat_forward(x, adj, params, *, alpha=0.1, row_tile=256, key_tile=512):
    """SpGAT.forward (eval mode)."""
    # TODO(synk): F.dropout is stochastic in training mode; implemented as identity (eval semantics).
    W1, a1_src, a1_dst, W2, a2_src, a2_dst = params
    nheads, nfeat, nhid = W1.shape
    nclass = W2.shape[1]
    n = x.shape[0]

    n_pad, tm, tk = _grid_plan(n, row_tile, key_tile)
    if n_pad != n:
        x = jnp.pad(x, ((0, n_pad - n), (0, 0)))
        adj = jnp.pad(adj, ((0, n_pad - n), (0, n_pad - n)))

    # adj only participates as a 0/1 mask: ship it as int8 (4x less HBM/VMEM than f32).
    adj_mask = (adj != 0).astype(jnp.int8)

    # ---- layer 1: all heads batched into one projection ----
    w1_all = jnp.transpose(W1, (1, 0, 2)).reshape(nfeat, nheads * nhid)     # (F, H*D)
    h1, f1 = _projection(x, w1_all, a1_src, a1_dst, tm=tm)
    x2 = _attention(adj_mask, _augment_keys(h1, nheads, nhid),
                    f1[:, :nheads], jnp.transpose(f1[:, nheads:]),          # fdst as (H, N)
                    alpha=alpha, nheads=nheads, nhid=nhid,
                    apply_log_softmax=False, tm=tm, tk=tk)                   # (N_pad, H*nhid)

    if n_pad != n:
        # Padded (degree-0) rows produce NaN (0/0) — zero them before feeding layer 2.
        valid = (jnp.arange(n_pad) < n)[:, None]
        x2 = jnp.where(valid, x2, 0.0)

    # ---- output layer: single "head" of width nclass, + F.elu + log_softmax fused ----
    h2, f2 = _projection(x2, W2, a2_src, a2_dst, tm=tm)
    out = _attention(adj_mask, _augment_keys(h2, 1, nclass),
                     f2[:, :1], jnp.transpose(f2[:, 1:]),
                     alpha=alpha, nheads=1, nhid=nclass,
                     apply_log_softmax=True, tm=tm, tk=tk)                   # (N_pad, nclass)
    return out[:n]


# ----------------------------------------------------------------------------------
# Parameters / demo
# ----------------------------------------------------------------------------------
def make_params(key, nfeat, nhid, nclass, nheads):
    """Deterministic xavier-uniform-ish init matching the module's parameter shapes."""
    ks = jax.random.split(key, 4)

    def xavier(k, shape, fan_in, fan_out):
        bound = jnp.sqrt(6.0 / (fan_in + fan_out))
        return jax.random.uniform(k, shape, jnp.float32, -bound, bound)

    # Per-head layer: W (nfeat, nhid), a (1, 2*nhid)  -> stacked over heads.
    W1 = xavier(ks[0], (nheads, nfeat, nhid), nfeat, nhid)
    a1 = xavier(ks[1], (nheads, 2 * nhid), 1, 2 * nhid)
    a1_src, a1_dst = a1[:, :nhid], a1[:, nhid:]
    # Output layer: W (nheads*nhid, nclass), a (1, 2*nclass).
    W2 = xavier(ks[2], (nheads * nhid, nclass), nheads * nhid, nclass)
    a2 = xavier(ks[3], (1, 2 * nclass), 1, 2 * nclass)
    a2_src, a2_dst = a2[:, :nclass], a2[:, nclass:]
    return (W1, a1_src, a1_dst, W2, a2_src, a2_dst)


if __name__ == "__main__":
    N, nfeat, nhid, nclass, nheads = 16, 16, 8, 4, 8
    alpha = 0.1

    key = jax.random.PRNGKey(0)
    k_x, k_adj, k_p = jax.random.split(key, 3)

    x = jax.random.normal(k_x, (N, nfeat), jnp.float32)
    # Random sparse-ish adjacency with self-loops (so every row has >= 1 edge).
    adj = (jax.random.uniform(k_adj, (N, N)) > 0.7).astype(jnp.float32)
    adj = jnp.maximum(adj, jnp.eye(N, dtype=jnp.float32))

    params = make_params(k_p, nfeat, nhid, nclass, nheads)

    out = jax.jit(functools.partial(spgat_forward, alpha=alpha))(x, adj, params)
    out = jax.block_until_ready(out)

    assert out.shape == (N, nclass)
    assert bool(jnp.all(jnp.isfinite(out)))
    # log_softmax rows must exp-sum to 1.
    assert bool(jnp.allclose(jnp.sum(jnp.exp(out), axis=1), 1.0, atol=1e-3))
    print("KERNEL_OK")
</pallas_src>

<mosaic_0001>
module attributes {stable_mosaic.version = 11 : i64} {
  func.func @_projection_kernel(%arg0: i32, %arg1: memref<16x16xbf16, #tpu.memory_space<vmem>>, %arg2: memref<16x64xbf16, #tpu.memory_space<vmem>>, %arg3: memref<64x16xf32, #tpu.memory_space<vmem>>, %arg4: memref<16x64xbf16, #tpu.memory_space<vmem>>, %arg5: memref<16x16xf32, #tpu.memory_space<vmem>>) attributes {dimension_semantics = [#tpu.dimension_semantics<parallel>], iteration_bounds = array<i64: 1>, scalar_prefetch = 0 : i64, scratch_operands = 0 : i64, tpu.core_type = #tpu.core_type<tc>, window_params = [{transform_indices = @transform_0, window_bounds = array<i64: 16, 16>}, {pipeline_mode = #tpu.pipeline_mode<synchronous>, transform_indices = @transform_1, window_bounds = array<i64: 16, 64>}, {pipeline_mode = #tpu.pipeline_mode<synchronous>, transform_indices = @transform_2, window_bounds = array<i64: 64, 16>}, {transform_indices = @transform_3, window_bounds = array<i64: 16, 64>}, {transform_indices = @transform_4, window_bounds = array<i64: 16, 16>}]} {
    %c0 = arith.constant 0 : index
    %c0_0 = arith.constant 0 : index
    %0 = vector.load %arg1[%c0, %c0_0] : memref<16x16xbf16, #tpu.memory_space<vmem>>, vector<16x16xbf16>
    %c0_1 = arith.constant 0 : index
    %c0_2 = arith.constant 0 : index
    %1 = vector.load %arg2[%c0_1, %c0_2] : memref<16x64xbf16, #tpu.memory_space<vmem>>, vector<16x64xbf16>
    %cst = arith.constant dense<0.000000e+00> : vector<16x64xf32>
    %2 = tpu.matmul %0, %1, %cst {dimension_numbers = #tpu.dot_dimension_numbers<[1], [0], [0], [1], [0, 0, 1, 1], [], []>} : vector<16x16xbf16>, vector<16x64xbf16>, vector<16x64xf32> -> vector<16x64xf32>
    %c0_3 = arith.constant 0 : index
    %c0_4 = arith.constant 0 : index
    %3 = vector.load %arg3[%c0_3, %c0_4] : memref<64x16xf32, #tpu.memory_space<vmem>>, vector<64x16xf32>
    %cst_5 = arith.constant dense<0.000000e+00> : vector<16x16xf32>
    %4 = tpu.matmul %2, %3, %cst_5 {dimension_numbers = #tpu.dot_dimension_numbers<[1], [0], [0], [1], [0, 0, 1, 1], [], []>} : vector<16x64xf32>, vector<64x16xf32>, vector<16x16xf32> -> vector<16x16xf32>
    %c0_6 = arith.constant 0 : index
    %c0_7 = arith.constant 0 : index
    %5 = vector.load %arg5[%c0_6, %c0_7] : memref<16x16xf32, #tpu.memory_space<vmem>>, vector<16x16xf32>
    tpu.vector_store %arg5[%c0_6, %c0_7], %4 {strides = array<i32>} : memref<16x16xf32, #tpu.memory_space<vmem>>, vector<16x16xf32>,
    %6 = arith.truncf %2 : vector<16x64xf32> to vector<16x64xbf16>
    %c0_8 = arith.constant 0 : index
    %c0_9 = arith.constant 0 : index
    %7 = vector.load %arg4[%c0_8, %c0_9] : memref<16x64xbf16, #tpu.memory_space<vmem>>, vector<16x64xbf16>
    tpu.vector_store %arg4[%c0_8, %c0_9], %6 {strides = array<i32>} : memref<16x64xbf16, #tpu.memory_space<vmem>>, vector<16x64xbf16>,
    return
  }
  func.func @transform_0(%arg0: i32) -> (i32, i32) {
    %c0_i32 = arith.constant 0 : i32
    %c0_i32_0 = arith.constant 0 : i32
    return %arg0, %c0_i32 : i32, i32
  }
  func.func @transform_1(%arg0: i32) -> (i32, i32) {
    %c0_i32 = arith.constant 0 : i32
    %c0_i32_0 = arith.constant 0 : i32
    %c0_i32_1 = arith.constant 0 : i32
    return %c0_i32, %c0_i32_0 : i32, i32
  }
  func.func @transform_2(%arg0: i32) -> (i32, i32) {
    %c0_i32 = arith.constant 0 : i32
    %c0_i32_0 = arith.constant 0 : i32
    %c0_i32_1 = arith.constant 0 : i32
    return %c0_i32, %c0_i32_0 : i32, i32
  }
  func.func @transform_3(%arg0: i32) -> (i32, i32) {
    %c0_i32 = arith.constant 0 : i32
    %c0_i32_0 = arith.constant 0 : i32
    return %arg0, %c0_i32 : i32, i32
  }
  func.func @transform_4(%arg0: i32) -> (i32, i32) {
    %c0_i32 = arith.constant 0 : i32
    %c0_i32_0 = arith.constant 0 : i32
    return %arg0, %c0_i32 : i32, i32
  }
}

module attributes {stable_mosaic.version = 11 : i64} {
  func.func @_attention_kernel(%arg0: i32, %arg1: i32, %arg2: memref<16x16xi8, #tpu.memory_space<vmem>>, %arg3: memref<16x72xbf16, #tpu.memory_space<vmem>>, %arg4: memref<16x8xf32, #tpu.memory_space<vmem>>, %arg5: memref<8x16xf32, #tpu.memory_space<vmem>>, %arg6: memref<16x64xf32, #tpu.memory_space<vmem>>, %arg7: memref<16x72xf32, #tpu.memory_space<vmem>>) attributes {dimension_semantics = [#tpu.dimension_semantics<parallel>, #tpu.dimension_semantics<arbitrary>], iteration_bounds = array<i64: 1, 1>, scalar_prefetch = 0 : i64, scratch_operands = 1 : i64, tpu.core_type = #tpu.core_type<tc>, window_params = [{transform_indices = @transform_0, window_bounds = array<i64: 16, 16>}, {transform_indices = @transform_1, window_bounds = array<i64: 16, 72>}, {transform_indices = @transform_2, window_bounds = array<i64: 16, 8>}, {transform_indices = @transform_3, window_bounds = array<i64: 8, 16>}, {transform_indices = @transform_4, window_bounds = array<i64: 16, 64>}]} {
    %c0_i32 = arith.constant 0 : i32
    %0 = arith.cmpi eq, %arg1, %c0_i32 : i32
    %1 = arith.extui %0 : i1 to i32
    %c0_i32_0 = arith.constant 0 : i32
    %2 = arith.cmpi ne, %1, %c0_i32_0 : i32
    scf.if %2 {
      %cst_53 = arith.constant 0.000000e+00 : f32
      %160 = vector.broadcast %cst_53 : f32 to vector<16x72xf32>
      %c0_54 = arith.constant 0 : index
      %c0_55 = arith.constant 0 : index
      %161 = vector.load %arg7[%c0_54, %c0_55] : memref<16x72xf32, #tpu.memory_space<vmem>>, vector<16x72xf32>
      tpu.vector_store %arg7[%c0_54, %c0_55], %160 {strides = array<i32>} : memref<16x72xf32, #tpu.memory_space<vmem>>, vector<16x72xf32>,
    } else {
    }
    %c0 = arith.constant 0 : index
    %c0_1 = arith.constant 0 : index
    %3 = vector.load %arg2[%c0, %c0_1] : memref<16x16xi8, #tpu.memory_space<vmem>>, vector<16x16xi8>
    %c0_i8 = arith.constant 0 : i8
    %4 = vector.broadcast %c0_i8 : i8 to vector<16x16xi8>
    %5 = arith.cmpi ne, %3, %4 : vector<16x16xi8>
    %c0_2 = arith.constant 0 : index
    %c0_3 = arith.constant 0 : index
    %6 = vector.load %arg3[%c0_2, %c0_3] : memref<16x72xbf16, #tpu.memory_space<vmem>>, vector<16x72xbf16>
    %c0_4 = arith.constant 0 : index
    %c0_5 = arith.constant 0 : index
    %7 = vector.load %arg4[%c0_4, %c0_5] : memref<16x8xf32, #tpu.memory_space<vmem>>, vector<16x8xf32>
    %c0_6 = arith.constant 0 : index
    %c0_7 = arith.constant 0 : index
    %8 = vector.load %arg5[%c0_6, %c0_7] : memref<8x16xf32, #tpu.memory_space<vmem>>, vector<8x16xf32>
    %9 = vector.extract_strided_slice %7 {offsets = [0, 0], sizes = [16, 1], strides = [1, 1]} : vector<16x8xf32> to vector<16x1xf32>
    %10 = vector.extract_strided_slice %8 {offsets = [0, 0], sizes = [1, 16], strides = [1, 1]} : vector<8x16xf32> to vector<1x16xf32>
    %11 = vector.broadcast %9 : vector<16x1xf32> to vector<16x16xf32>
    %12 = vector.broadcast %10 : vector<1x16xf32> to vector<16x16xf32>
    %13 = arith.addf %11, %12 : vector<16x16xf32>
    %cst = arith.constant 0.000000e+00 : f32
    %14 = vector.broadcast %cst : f32 to vector<16x16xf32>
    %15 = arith.cmpf ogt, %13, %14 : vector<16x16xf32>
    %cst_8 = arith.constant 1.000000e-01 : f32
    %16 = vector.broadcast %cst_8 : f32 to vector<16x16xf32>
    %17 = arith.mulf %16, %13 : vector<16x16xf32>
    %18 = arith.select %15, %13, %17 : vector<16x16xi1>, vector<16x16xf32>
    %cst_9 = arith.constant 0.000000e+00 : f32
    %19 = vector.broadcast %cst_9 : f32 to vector<16x16xf32>
    %20 = arith.subf %19, %18 : vector<16x16xf32>
    %21 = math.exp %20 : vector<16x16xf32>
    %cst_10 = arith.constant 0.000000e+00 : f32
    %22 = vector.broadcast %cst_10 : f32 to vector<16x16xf32>
    %23 = arith.select %5, %21, %22 : vector<16x16xi1>, vector<16x16xf32>
    %24 = arith.truncf %23 : vector<16x16xf32> to vector<16x16xbf16>
    %25 = vector.extract_strided_slice %6 {offsets = [0, 0], sizes = [16, 9], strides = [1, 1]} : vector<16x72xbf16> to vector<16x9xbf16>
    %cst_11 = arith.constant dense<0.000000e+00> : vector<16x9xf32>
    %26 = tpu.matmul %24, %25, %cst_11 {dimension_numbers = #tpu.dot_dimension_numbers<[1], [0], [0], [1], [0, 0, 1, 1], [], []>} : vector<16x16xbf16>, vector<16x9xbf16>, vector<16x9xf32> -> vector<16x9xf32>
    %27 = vector.extract_strided_slice %7 {offsets = [0, 1], sizes = [16, 1], strides = [1, 1]} : vector<16x8xf32> to vector<16x1xf32>
    %28 = vector.extract_strided_slice %8 {offsets = [1, 0], sizes = [1, 16], strides = [1, 1]} : vector<8x16xf32> to vector<1x16xf32>
    %29 = vector.broadcast %27 : vector<16x1xf32> to vector<16x16xf32>
    %30 = vector.broadcast %28 : vector<1x16xf32> to vector<16x16xf32>
    %31 = arith.addf %29, %30 : vector<16x16xf32>
    %cst_12 = arith.constant 0.000000e+00 : f32
    %32 = vector.broadcast %cst_12 : f32 to vector<16x16xf32>
    %33 = arith.cmpf ogt, %31, %32 : vector<16x16xf32>
    %cst_13 = arith.constant 1.000000e-01 : f32
    %34 = vector.broadcast %cst_13 : f32 to vector<16x16xf32>
    %35 = arith.mulf %34, %31 : vector<16x16xf32>
    %36 = arith.select %33, %31, %35 : vector<16x16xi1>, vector<16x16xf32>
    %cst_14 = arith.constant 0.000000e+00 : f32
    %37 = vector.broadcast %cst_14 : f32 to vector<16x16xf32>
    %38 = arith.subf %37, %36 : vector<16x16xf32>
    %39 = math.exp %38 : vector<16x16xf32>
    %cst_15 = arith.constant 0.000000e+00 : f32
    %40 = vector.broadcast %cst_15 : f32 to vector<16x16xf32>
    %41 = arith.select %5, %39, %40 : vector<16x16xi1>, vector<16x16xf32>
    %42 = arith.truncf %41 : vector<16x16xf32> to vector<16x16xbf16>
    %43 = vector.extract_strided_slice %6 {offsets = [0, 9], sizes = [16, 9], strides = [1, 1]} : vector<16x72xbf16> to vector<16x9xbf16>
    %cst_16 = arith.constant dense<0.000000e+00> : vector<16x9xf32>
    %44 = tpu.matmul %42, %43, %cst_16 {dimension_numbers = #tpu.dot_dimension_numbers<[1], [0], [0], [1], [0, 0, 1, 1], [], []>} : vector<16x16xbf16>, vector<16x9xbf16>, vector<16x9xf32> -> vector<16x9xf32>
    %45 = vector.extract_strided_slice %7 {offsets = [0, 2], sizes = [16, 1], strides = [1, 1]} : vector<16x8xf32> to vector<16x1xf32>
    %46 = vector.extract_strided_slice %8 {offsets = [2, 0], sizes = [1, 16], strides = [1, 1]} : vector<8x16xf32> to vector<1x16xf32>
    %47 = vector.broadcast %45 : vector<16x1xf32> to vector<16x16xf32>
    %48 = vector.broadcast %46 : vector<1x16xf32> to vector<16x16xf32>
    %49 = arith.addf %47, %48 : vector<16x16xf32>
    %cst_17 = arith.constant 0.000000e+00 : f32
    %50 = vector.broadcast %cst_17 : f32 to vector<16x16xf32>
    %51 = arith.cmpf ogt, %49, %50 : vector<16x16xf32>
    %cst_18 = arith.constant 1.000000e-01 : f32
    %52 = vector.broadcast %cst_18 : f32 to vector<16x16xf32>
    %53 = arith.mulf %52, %49 : vector<16x16xf32>
    %54 = arith.select %51, %49, %53 : vector<16x16xi1>, vector<16x16xf32>
    %cst_19 = arith.constant 0.000000e+00 : f32
    %55 = vector.broadcast %cst_19 : f32 to vector<16x16xf32>
    %56 = arith.subf %55, %54 : vector<16x16xf32>
    %57 = math.exp %56 : vector<16x16xf32>
    %cst_20 = arith.constant 0.000000e+00 : f32
    %58 = vector.broadcast %cst_20 : f32 to vector<16x16xf32>
    %59 = arith.select %5, %57, %58 : vector<16x16xi1>, vector<16x16xf32>
    %60 = arith.truncf %59 : vector<16x16xf32> to vector<16x16xbf16>
    %61 = vector.extract_strided_slice %6 {offsets = [0, 18], sizes = [16, 9], strides = [1, 1]} : vector<16x72xbf16> to vector<16x9xbf16>
    %cst_21 = arith.constant dense<0.000000e+00> : vector<16x9xf32>
    %62 = tpu.matmul %60, %61, %cst_21 {dimension_numbers = #tpu.dot_dimension_numbers<[1], [0], [0], [1], [0, 0, 1, 1], [], []>} : vector<16x16xbf16>, vector<16x9xbf16>, vector<16x9xf32> -> vector<16x9xf32>
    %63 = vector.extract_strided_slice %7 {offsets = [0, 3], sizes = [16, 1], strides = [1, 1]} : vector<16x8xf32> to vector<16x1xf32>
    %64 = vector.extract_strided_slice %8 {offsets = [3, 0], sizes = [1, 16], strides = [1, 1]} : vector<8x16xf32> to vector<1x16xf32>
    %65 = vector.broadcast %63 : vector<16x1xf32> to vector<16x16xf32>
    %66 = vector.broadcast %64 : vector<1x16xf32> to vector<16x16xf32>
    %67 = arith.addf %65, %66 : vector<16x16xf32>
    %cst_22 = arith.constant 0.000000e+00 : f32
    %68 = vector.broadcast %cst_22 : f32 to vector<16x16xf32>
    %69 = arith.cmpf ogt, %67, %68 : vector<16x16xf32>
    %cst_23 = arith.constant 1.000000e-01 : f32
    %70 = vector.broadcast %cst_23 : f32 to vector<16x16xf32>
    %71 = arith.mulf %70, %67 : vector<16x16xf32>
    %72 = arith.select %69, %67, %71 : vector<16x16xi1>, vector<16x16xf32>
    %cst_24 = arith.constant 0.000000e+00 : f32
    %73 = vector.broadcast %cst_24 : f32 to vector<16x16xf32>
    %74 = arith.subf %73, %72 : vector<16x16xf32>
    %75 = math.exp %74 : vector<16x16xf32>
    %cst_25 = arith.constant 0.000000e+00 : f32
    %76 = vector.broadcast %cst_25 : f32 to vector<16x16xf32>
    %77 = arith.select %5, %75, %76 : vector<16x16xi1>, vector<16x16xf32>
    %78 = arith.truncf %77 : vector<16x16xf32> to vector<16x16xbf16>
    %79 = vector.extract_strided_slice %6 {offsets = [0, 27], sizes = [16, 9], strides = [1, 1]} : vector<16x72xbf16> to vector<16x9xbf16>
    %cst_26 = arith.constant dense<0.000000e+00> : vector<16x9xf32>
    %80 = tpu.matmul %78, %79, %cst_26 {dimension_numbers = #tpu.dot_dimension_numbers<[1], [0], [0], [1], [0, 0, 1, 1], [], []>} : vector<16x16xbf16>, vector<16x9xbf16>, vector<16x9xf32> -> vector<16x9xf32>
    %81 = vector.extract_strided_slice %7 {offsets = [0, 4], sizes = [16, 1], strides = [1, 1]} : vector<16x8xf32> to vector<16x1xf32>
    %82 = vector.extract_strided_slice %8 {offsets = [4, 0], sizes = [1, 16], strides = [1, 1]} : vector<8x16xf32> to vector<1x16xf32>
    %83 = vector.broadcast %81 : vector<16x1xf32> to vector<16x16xf32>
    %84 = vector.broadcast %82 : vector<1x16xf32> to vector<16x16xf32>
    %85 = arith.addf %83, %84 : vector<16x16xf32>
    %cst_27 = arith.constant 0.000000e+00 : f32
    %86 = vector.broadcast %cst_27 : f32 to vector<16x16xf32>
    %87 = arith.cmpf ogt, %85, %86 : vector<16x16xf32>
    %cst_28 = arith.constant 1.000000e-01 : f32
    %88 = vector.broadcast %cst_28 : f32 to vector<16x16xf32>
    %89 = arith.mulf %88, %85 : vector<16x16xf32>
    %90 = arith.select %87, %85, %89 : vector<16x16xi1>, vector<16x16xf32>
    %cst_29 = arith.constant 0.000000e+00 : f32
    %91 = vector.broadcast %cst_29 : f32 to vector<16x16xf32>
    %92 = arith.subf %91, %90 : vector<16x16xf32>
    %93 = math.exp %92 : vector<16x16xf32>
    %cst_30 = arith.constant 0.000000e+00 : f32
    %94 = vector.broadcast %cst_30 : f32 to vector<16x16xf32>
    %95 = arith.select %5, %93, %94 : vector<16x16xi1>, vector<16x16xf32>
    %96 = arith.truncf %95 : vector<16x16xf32> to vector<16x16xbf16>
    %97 = vector.extract_strided_slice %6 {offsets = [0, 36], sizes = [16, 9], strides = [1, 1]} : vector<16x72xbf16> to vector<16x9xbf16>
    %cst_31 = arith.constant dense<0.000000e+00> : vector<16x9xf32>
    %98 = tpu.matmul %96, %97, %cst_31 {dimension_numbers = #tpu.dot_dimension_numbers<[1], [0], [0], [1], [0, 0, 1, 1], [], []>} : vector<16x16xbf16>, vector<16x9xbf16>, vector<16x9xf32> -> vector<16x9xf32>
    %99 = vector.extract_strided_slice %7 {offsets = [0, 5], sizes = [16, 1], strides = [1, 1]} : vector<16x8xf32> to vector<16x1xf32>
    %100 = vector.extract_strided_slice %8 {offsets = [5, 0], sizes = [1, 16], strides = [1, 1]} : vector<8x16xf32> to vector<1x16xf32>
    %101 = vector.broadcast %99 : vector<16x1xf32> to vector<16x16xf32>
    %102 = vector.broadcast %100 : vector<1x16xf32> to vector<16x16xf32>
    %103 = arith.addf %101, %102 : vector<16x16xf32>
    %cst_32 = arith.constant 0.000000e+00 : f32
    %104 = vector.broadcast %cst_32 : f32 to vector<16x16xf32>
    %105 = arith.cmpf ogt, %103, %104 : vector<16x16xf32>
    %cst_33 = arith.constant 1.000000e-01 : f32
    %106 = vector.broadcast %cst_33 : f32 to vector<16x16xf32>
    %107 = arith.mulf %106, %103 : vector<16x16xf32>
    %108 = arith.select %105, %103, %107 : vector<16x16xi1>, vector<16x16xf32>
    %cst_34 = arith.constant 0.000000e+00 : f32
    %109 = vector.broadcast %cst_34 : f32 to vector<16x16xf32>
    %110 = arith.subf %109, %108 : vector<16x16xf32>
    %111 = math.exp %110 : vector<16x16xf32>
    %cst_35 = arith.constant 0.000000e+00 : f32
    %112 = vector.broadcast %cst_35 : f32 to vector<16x16xf32>
    %113 = arith.select %5, %111, %112 : vector<16x16xi1>, vector<16x16xf32>
    %114 = arith.truncf %113 : vector<16x16xf32> to vector<16x16xbf16>
    %115 = vector.extract_strided_slice %6 {offsets = [0, 45], sizes = [16, 9], strides = [1, 1]} : vector<16x72xbf16> to vector<16x9xbf16>
    %cst_36 = arith.constant dense<0.000000e+00> : vector<16x9xf32>
    %116 = tpu.matmul %114, %115, %cst_36 {dimension_numbers = #tpu.dot_dimension_numbers<[1], [0], [0], [1], [0, 0, 1, 1], [], []>} : vector<16x16xbf16>, vector<16x9xbf16>, vector<16x9xf32> -> vector<16x9xf32>
    %117 = vector.extract_strided_slice %7 {offsets = [0, 6], sizes = [16, 1], strides = [1, 1]} : vector<16x8xf32> to vector<16x1xf32>
    %118 = vector.extract_strided_slice %8 {offsets = [6, 0], sizes = [1, 16], strides = [1, 1]} : vector<8x16xf32> to vector<1x16xf32>
    %119 = vector.broadcast %117 : vector<16x1xf32> to vector<16x16xf32>
    %120 = vector.broadcast %118 : vector<1x16xf32> to vector<16x16xf32>
    %121 = arith.addf %119, %120 : vector<16x16xf32>
    %cst_37 = arith.constant 0.000000e+00 : f32
    %122 = vector.broadcast %cst_37 : f32 to vector<16x16xf32>
    %123 = arith.cmpf ogt, %121, %122 : vector<16x16xf32>
    %cst_38 = arith.constant 1.000000e-01 : f32
    %124 = vector.broadcast %cst_38 : f32 to vector<16x16xf32>
    %125 = arith.mulf %124, %121 : vector<16x16xf32>
    %126 = arith.select %123, %121, %125 : vector<16x16xi1>, vector<16x16xf32>
    %cst_39 = arith.constant 0.000000e+00 : f32
    %127 = vector.broadcast %cst_39 : f32 to vector<16x16xf32>
    %128 = arith.subf %127, %126 : vector<16x16xf32>
    %129 = math.exp %128 : vector<16x16xf32>
    %cst_40 = arith.constant 0.000000e+00 : f32
    %130 = vector.broadcast %cst_40 : f32 to vector<16x16xf32>
    %131 = arith.select %5, %129, %130 : vector<16x16xi1>, vector<16x16xf32>
    %132 = arith.truncf %131 : vector<16x16xf32> to vector<16x16xbf16>
    %133 = vector.extract_strided_slice %6 {offsets = [0, 54], sizes = [16, 9], strides = [1, 1]} : vector<16x72xbf16> to vector<16x9xbf16>
    %cst_41 = arith.constant dense<0.000000e+00> : vector<16x9xf32>
    %134 = tpu.matmul %132, %133, %cst_41 {dimension_numbers = #tpu.dot_dimension_numbers<[1], [0], [0], [1], [0, 0, 1, 1], [], []>} : vector<16x16xbf16>, vector<16x9xbf16>, vector<16x9xf32> -> vector<16x9xf32>
    %135 = vector.extract_strided_slice %7 {offsets = [0, 7], sizes = [16, 1], strides = [1, 1]} : vector<16x8xf32> to vector<16x1xf32>
    %136 = vector.extract_strided_slice %8 {offsets = [7, 0], sizes = [1, 16], strides = [1, 1]} : vector<8x16xf32> to vector<1x16xf32>
    %137 = vector.broadcast %135 : vector<16x1xf32> to vector<16x16xf32>
    %138 = vector.broadcast %136 : vector<1x16xf32> to vector<16x16xf32>
    %139 = arith.addf %137, %138 : vector<16x16xf32>
    %cst_42 = arith.constant 0.000000e+00 : f32
    %140 = vector.broadcast %cst_42 : f32 to vector<16x16xf32>
    %141 = arith.cmpf ogt, %139, %140 : vector<16x16xf32>
    %cst_43 = arith.constant 1.000000e-01 : f32
    %142 = vector.broadcast %cst_43 : f32 to vector<16x16xf32>
    %143 = arith.mulf %142, %139 : vector<16x16xf32>
    %144 = arith.select %141, %139, %143 : vector<16x16xi1>, vector<16x16xf32>
    %cst_44 = arith.constant 0.000000e+00 : f32
    %145 = vector.broadcast %cst_44 : f32 to vector<16x16xf32>
    %146 = arith.subf %145, %144 : vector<16x16xf32>
    %147 = math.exp %146 : vector<16x16xf32>
    %cst_45 = arith.constant 0.000000e+00 : f32
    %148 = vector.broadcast %cst_45 : f32 to vector<16x16xf32>
    %149 = arith.select %5, %147, %148 : vector<16x16xi1>, vector<16x16xf32>
    %150 = arith.truncf %149 : vector<16x16xf32> to vector<16x16xbf16>
    %151 = vector.extract_strided_slice %6 {offsets = [0, 63], sizes = [16, 9], strides = [1, 1]} : vector<16x72xbf16> to vector<16x9xbf16>
    %cst_46 = arith.constant dense<0.000000e+00> : vector<16x9xf32>
    %152 = tpu.matmul %150, %151, %cst_46 {dimension_numbers = #tpu.dot_dimension_numbers<[1], [0], [0], [1], [0, 0, 1, 1], [], []>} : vector<16x16xbf16>, vector<16x9xbf16>, vector<16x9xf32> -> vector<16x9xf32>
    %c0_47 = arith.constant 0 : index
    %c0_48 = arith.constant 0 : index
    %153 = vector.load %arg7[%c0_47, %c0_48] : memref<16x72xf32, #tpu.memory_space<vmem>>, vector<16x72xf32>
    %154 = tpu.concatenate %26, %44, %62, %80, %98, %116, %134, %152 in 1 : vector<16x9xf32>, vector<16x9xf32>, vector<16x9xf32>, vector<16x9xf32>, vector<16x9xf32>, vector<16x9xf32>, vector<16x9xf32>, vector<16x9xf32> -> vector<16x72xf32>
    %155 = arith.addf %153, %154 : vector<16x72xf32>
    %c0_49 = arith.constant 0 : index
    %c0_50 = arith.constant 0 : index
    %156 = vector.load %arg7[%c0_49, %c0_50] : memref<16x72xf32, #tpu.memory_space<vmem>>, vector<16x72xf32>
    tpu.vector_store %arg7[%c0_49, %c0_50], %155 {strides = array<i32>} : memref<16x72xf32, #tpu.memory_space<vmem>>, vector<16x72xf32>,
    %c0_i32_51 = arith.constant 0 : i32
    %157 = arith.cmpi eq, %arg1, %c0_i32_51 : i32
    %158 = arith.extui %157 : i1 to i32
    %c0_i32_52 = arith.constant 0 : i32
    %159 = arith.cmpi ne, %158, %c0_i32_52 : i32
    scf.if %159 {
      %c0_53 = arith.constant 0 : index
      %c0_54 = arith.constant 0 : index
      %160 = vector.load %arg7[%c0_53, %c0_54] : memref<16x72xf32, #tpu.memory_space<vmem>>, vector<16x72xf32>
      %161 = vector.extract_strided_slice %160 {offsets = [0, 0], sizes = [16, 9], strides = [1, 1]} : vector<16x72xf32> to vector<16x9xf32>
      %162 = vector.extract_strided_slice %161 {offsets = [0, 0], sizes = [16, 8], strides = [1, 1]} : vector<16x9xf32> to vector<16x8xf32>
      %163 = vector.extract_strided_slice %161 {offsets = [0, 8], sizes = [16, 1], strides = [1, 1]} : vector<16x9xf32> to vector<16x1xf32>
      %164 = vector.broadcast %163 : vector<16x1xf32> to vector<16x8xf32>
      %165 = arith.divf %162, %164 : vector<16x8xf32>
      %cst_55 = arith.constant 0.000000e+00 : f32
      %166 = vector.broadcast %cst_55 : f32 to vector<16x8xf32>
      %167 = arith.cmpf ogt, %165, %166 : vector<16x8xf32>
      %168 = math.exp %165 : vector<16x8xf32>
      %cst_56 = arith.constant 1.000000e+00 : f32
      %169 = vector.broadcast %cst_56 : f32 to vector<16x8xf32>
      %170 = arith.subf %168, %169 : vector<16x8xf32>
      %171 = arith.select %167, %165, %170 : vector<16x8xi1>, vector<16x8xf32>
      %172 = vector.extract_strided_slice %160 {offsets = [0, 9], sizes = [16, 9], strides = [1, 1]} : vector<16x72xf32> to vector<16x9xf32>
      %173 = vector.extract_strided_slice %172 {offsets = [0, 0], sizes = [16, 8], strides = [1, 1]} : vector<16x9xf32> to vector<16x8xf32>
      %174 = vector.extract_strided_slice %172 {offsets = [0, 8], sizes = [16, 1], strides = [1, 1]} : vector<16x9xf32> to vector<16x1xf32>
      %175 = vector.broadcast %174 : vector<16x1xf32> to vector<16x8xf32>
      %176 = arith.divf %173, %175 : vector<16x8xf32>
      %cst_57 = arith.constant 0.000000e+00 : f32
      %177 = vector.broadcast %cst_57 : f32 to vector<16x8xf32>
      %178 = arith.cmpf ogt, %176, %177 : vector<16x8xf32>
      %179 = math.exp %176 : vector<16x8xf32>
      %cst_58 = arith.constant 1.000000e+00 : f32
      %180 = vector.broadcast %cst_58 : f32 to vector<16x8xf32>
      %181 = arith.subf %179, %180 : vector<16x8xf32>
      %182 = arith.select %178, %176, %181 : vector<16x8xi1>, vector<16x8xf32>
      %183 = vector.extract_strided_slice %160 {offsets = [0, 18], sizes = [16, 9], strides = [1, 1]} : vector<16x72xf32> to vector<16x9xf32>
      %184 = vector.extract_strided_slice %183 {offsets = [0, 0], sizes = [16, 8], strides = [1, 1]} : vector<16x9xf32> to vector<16x8xf32>
      %185 = vector.extract_strided_slice %183 {offsets = [0, 8], sizes = [16, 1], strides = [1, 1]} : vector<16x9xf32> to vector<16x1xf32>
      %186 = vector.broadcast %185 : vector<16x1xf32> to vector<16x8xf32>
      %187 = arith.divf %184, %186 : vector<16x8xf32>
      %cst_59 = arith.constant 0.000000e+00 : f32
      %188 = vector.broadcast %cst_59 : f32 to vector<16x8xf32>
      %189 = arith.cmpf ogt, %187, %188 : vector<16x8xf32>
      %190 = math.exp %187 : vector<16x8xf32>
      %cst_60 = arith.constant 1.000000e+00 : f32
      %191 = vector.broadcast %cst_60 : f32 to vector<16x8xf32>
      %192 = arith.subf %190, %191 : vector<16x8xf32>
      %193 = arith.select %189, %187, %192 : vector<16x8xi1>, vector<16x8xf32>
      %194 = vector.extract_strided_slice %160 {offsets = [0, 27], sizes = [16, 9], strides = [1, 1]} : vector<16x72xf32> to vector<16x9xf32>
      %195 = vector.extract_strided_slice %194 {offsets = [0, 0], sizes = [16, 8], strides = [1, 1]} : vector<16x9xf32> to vector<16x8xf32>
      %196 = vector.extract_strided_slice %194 {offsets = [0, 8], sizes = [16, 1], strides = [1, 1]} : vector<16x9xf32> to vector<16x1xf32>
      %197 = vector.broadcast %196 : vector<16x1xf32> to vector<16x8xf32>
      %198 = arith.divf %195, %197 : vector<16x8xf32>
      %cst_61 = arith.constant 0.000000e+00 : f32
      %199 = vector.broadcast %cst_61 : f32 to vector<16x8xf32>
      %200 = arith.cmpf ogt, %198, %199 : vector<16x8xf32>
      %201 = math.exp %198 : vector<16x8xf32>
      %cst_62 = arith.constant 1.000000e+00 : f32
      %202 = vector.broadcast %cst_62 : f32 to vector<16x8xf32>
      %203 = arith.subf %201, %202 : vector<16x8xf32>
      %204 = arith.select %200, %198, %203 : vector<16x8xi1>, vector<16x8xf32>
      %205 = vector.extract_strided_slice %160 {offsets = [0, 36], sizes = [16, 9], strides = [1, 1]} : vector<16x72xf32> to vector<16x9xf32>
      %206 = vector.extract_strided_slice %205 {offsets = [0, 0], sizes = [16, 8], strides = [1, 1]} : vector<16x9xf32> to vector<16x8xf32>
      %207 = vector.extract_strided_slice %205 {offsets = [0, 8], sizes = [16, 1], strides = [1, 1]} : vector<16x9xf32> to vector<16x1xf32>
      %208 = vector.broadcast %207 : vector<16x1xf32> to vector<16x8xf32>
      %209 = arith.divf %206, %208 : vector<16x8xf32>
      %cst_63 = arith.constant 0.000000e+00 : f32
      %210 = vector.broadcast %cst_63 : f32 to vector<16x8xf32>
      %211 = arith.cmpf ogt, %209, %210 : vector<16x8xf32>
      %212 = math.exp %209 : vector<16x8xf32>
      %cst_64 = arith.constant 1.000000e+00 : f32
      %213 = vector.broadcast %cst_64 : f32 to vector<16x8xf32>
      %214 = arith.subf %212, %213 : vector<16x8xf32>
      %215 = arith.select %211, %209, %214 : vector<16x8xi1>, vector<16x8xf32>
      %216 = vector.extract_strided_slice %160 {offsets = [0, 45], sizes = [16, 9], strides = [1, 1]} : vector<16x72xf32> to vector<16x9xf32>
      %217 = vector.extract_strided_slice %216 {offsets = [0, 0], sizes = [16, 8], strides = [1, 1]} : vector<16x9xf32> to vector<16x8xf32>
      %218 = vector.extract_strided_slice %216 {offsets = [0, 8], sizes = [16, 1], strides = [1, 1]} : vector<16x9xf32> to vector<16x1xf32>
      %219 = vector.broadcast %218 : vector<16x1xf32> to vector<16x8xf32>
      %220 = arith.divf %217, %219 : vector<16x8xf32>
      %cst_65 = arith.constant 0.000000e+00 : f32
      %221 = vector.broadcast %cst_65 : f32 to vector<16x8xf32>
      %222 = arith.cmpf ogt, %220, %221 : vector<16x8xf32>
      %223 = math.exp %220 : vector<16x8xf32>
      %cst_66 = arith.constant 1.000000e+00 : f32
      %224 = vector.broadcast %cst_66 : f32 to vector<16x8xf32>
      %225 = arith.subf %223, %224 : vector<16x8xf32>
      %226 = arith.select %222, %220, %225 : vector<16x8xi1>, vector<16x8xf32>
      %227 = vector.extract_strided_slice %160 {offsets = [0, 54], sizes = [16, 9], strides = [1, 1]} : vector<16x72xf32> to vector<16x9xf32>
      %228 = vector.extract_strided_slice %227 {offsets = [0, 0], sizes = [16, 8], strides = [1, 1]} : vector<16x9xf32> to vector<16x8xf32>
      %229 = vector.extract_strided_slice %227 {offsets = [0, 8], sizes = [16, 1], strides = [1, 1]} : vector<16x9xf32> to vector<16x1xf32>
      %230 = vector.broadcast %229 : vector<16x1xf32> to vector<16x8xf32>
      %231 = arith.divf %228, %230 : vector<16x8xf32>
      %cst_67 = arith.constant 0.000000e+00 : f32
      %232 = vector.broadcast %cst_67 : f32 to vector<16x8xf32>
      %233 = arith.cmpf ogt, %231, %232 : vector<16x8xf32>
      %234 = math.exp %231 : vector<16x8xf32>
      %cst_68 = arith.constant 1.000000e+00 : f32
      %235 = vector.broadcast %cst_68 : f32 to vector<16x8xf32>
      %236 = arith.subf %234, %235 : vector<16x8xf32>
      %237 = arith.select %233, %231, %236 : vector<16x8xi1>, vector<16x8xf32>
      %238 = vector.extract_strided_slice %160 {offsets = [0, 63], sizes = [16, 9], strides = [1, 1]} : vector<16x72xf32> to vector<16x9xf32>
      %239 = vector.extract_strided_slice %238 {offsets = [0, 0], sizes = [16, 8], strides = [1, 1]} : vector<16x9xf32> to vector<16x8xf32>
      %240 = vector.extract_strided_slice %238 {offsets = [0, 8], sizes = [16, 1], strides = [1, 1]} : vector<16x9xf32> to vector<16x1xf32>
      %241 = vector.broadcast %240 : vector<16x1xf32> to vector<16x8xf32>
      %242 = arith.divf %239, %241 : vector<16x8xf32>
      %cst_69 = arith.constant 0.000000e+00 : f32
      %243 = vector.broadcast %cst_69 : f32 to vector<16x8xf32>
      %244 = arith.cmpf ogt, %242, %243 : vector<16x8xf32>
      %245 = math.exp %242 : vector<16x8xf32>
      %cst_70 = arith.constant 1.000000e+00 : f32
      %246 = vector.broadcast %cst_70 : f32 to vector<16x8xf32>
      %247 = arith.subf %245, %246 : vector<16x8xf32>
      %248 = arith.select %244, %242, %247 : vector<16x8xi1>, vector<16x8xf32>
      %249 = tpu.concatenate %171, %182, %193, %204, %215, %226, %237, %248 in 1 : vector<16x8xf32>, vector<16x8xf32>, vector<16x8xf32>, vector<16x8xf32>, vector<16x8xf32>, vector<16x8xf32>, vector<16x8xf32>, vector<16x8xf32> -> vector<16x64xf32>
      %c0_71 = arith.constant 0 : index
      %c0_72 = arith.constant 0 : index
      %250 = vector.load %arg6[%c0_71, %c0_72] : memref<16x64xf32, #tpu.memory_space<vmem>>, vector<16x64xf32>
      tpu.vector_store %arg6[%c0_71, %c0_72], %249 {strides = array<i32>} : memref<16x64xf32, #tpu.memory_space<vmem>>, vector<16x64xf32>,
    } else {
    }
    return
  }
  func.func @transform_0(%arg0: i32, %arg1: i32) -> (i32, i32) {
    %c0_i32 = arith.constant 0 : i32
    return %arg0, %arg1 : i32, i32
  }
  func.func @transform_1(%arg0: i32, %arg1: i32) -> (i32, i32) {
    %c0_i32 = arith.constant 0 : i32
    %c0_i32_0 = arith.constant 0 : i32
    return %arg1, %c0_i32 : i32, i32
  }
  func.func @transform_2(%arg0: i32, %arg1: i32) -> (i32, i32) {
    %c0_i32 = arith.constant 0 : i32
    %c0_i32_0 = arith.constant 0 : i32
    return %arg0, %c0_i32 : i32, i32
  }
  func.func @transform_3(%arg0: i32, %arg1: i32) -> (i32, i32) {
    %c0_i32 = arith.constant 0 : i32
    %c0_i32_0 = arith.constant 0 : i32
    return %c0_i32, %arg1 : i32, i32
  }
  func.func @transform_4(%arg0: i32, %arg1: i32) -> (i32, i32) {
    %c0_i32 = arith.constant 0 : i32
    %c0_i32_0 = arith.constant 0 : i32
    return %arg0, %c0_i32 : i32, i32
  }
}

module attributes {stable_mosaic.version = 11 : i64} {
  func.func @_projection_kernel(%arg0: i32, %arg1: memref<16x64xbf16, #tpu.memory_space<vmem>>, %arg2: memref<64x4xbf16, #tpu.memory_space<vmem>>, %arg3: memref<4x2xf32, #tpu.memory_space<vmem>>, %arg4: memref<16x4xbf16, #tpu.memory_space<vmem>>, %arg5: memref<16x2xf32, #tpu.memory_space<vmem>>) attributes {dimension_semantics = [#tpu.dimension_semantics<parallel>], iteration_bounds = array<i64: 1>, scalar_prefetch = 0 : i64, scratch_operands = 0 : i64, tpu.core_type = #tpu.core_type<tc>, window_params = [{transform_indices = @transform_0, window_bounds = array<i64: 16, 64>}, {pipeline_mode = #tpu.pipeline_mode<synchronous>, transform_indices = @transform_1, window_bounds = array<i64: 64, 4>}, {pipeline_mode = #tpu.pipeline_mode<synchronous>, transform_indices = @transform_2, window_bounds = array<i64: 4, 2>}, {transform_indices = @transform_3, window_bounds = array<i64: 16, 4>}, {transform_indices = @transform_4, window_bounds = array<i64: 16, 2>}]} {
    %c0 = arith.constant 0 : index
    %c0_0 = arith.constant 0 : index
    %0 = vector.load %arg1[%c0, %c0_0] : memref<16x64xbf16, #tpu.memory_space<vmem>>, vector<16x64xbf16>
    %c0_1 = arith.constant 0 : index
    %c0_2 = arith.constant 0 : index
    %1 = vector.load %arg2[%c0_1, %c0_2] : memref<64x4xbf16, #tpu.memory_space<vmem>>, vector<64x4xbf16>
    %cst = arith.constant dense<0.000000e+00> : vector<16x4xf32>
    %2 = tpu.matmul %0, %1, %cst {dimension_numbers = #tpu.dot_dimension_numbers<[1], [0], [0], [1], [0, 0, 1, 1], [], []>} : vector<16x64xbf16>, vector<64x4xbf16>, vector<16x4xf32> -> vector<16x4xf32>
    %c0_3 = arith.constant 0 : index
    %c0_4 = arith.constant 0 : index
    %3 = vector.load %arg3[%c0_3, %c0_4] : memref<4x2xf32, #tpu.memory_space<vmem>>, vector<4x2xf32>
    %cst_5 = arith.constant dense<0.000000e+00> : vector<16x2xf32>
    %4 = tpu.matmul %2, %3, %cst_5 {dimension_numbers = #tpu.dot_dimension_numbers<[1], [0], [0], [1], [0, 0, 1, 1], [], []>} : vector<16x4xf32>, vector<4x2xf32>, vector<16x2xf32> -> vector<16x2xf32>
    %c0_6 = arith.constant 0 : index
    %c0_7 = arith.constant 0 : index
    %5 = vector.load %arg5[%c0_6, %c0_7] : memref<16x2xf32, #tpu.memory_space<vmem>>, vector<16x2xf32>
    tpu.vector_store %arg5[%c0_6, %c0_7], %4 {strides = array<i32>} : memref<16x2xf32, #tpu.memory_space<vmem>>, vector<16x2xf32>,
    %6 = arith.truncf %2 : vector<16x4xf32> to vector<16x4xbf16>
    %c0_8 = arith.constant 0 : index
    %c0_9 = arith.constant 0 : index
    %7 = vector.load %arg4[%c0_8, %c0_9] : memref<16x4xbf16, #tpu.memory_space<vmem>>, vector<16x4xbf16>
    tpu.vector_store %arg4[%c0_8, %c0_9], %6 {strides = array<i32>} : memref<16x4xbf16, #tpu.memory_space<vmem>>, vector<16x4xbf16>,
    return
  }
  func.func @transform_0(%arg0: i32) -> (i32, i32) {
    %c0_i32 = arith.constant 0 : i32
    %c0_i32_0 = arith.constant 0 : i32
    return %arg0, %c0_i32 : i32, i32
  }
  func.func @transform_1(%arg0: i32) -> (i32, i32) {
    %c0_i32 = arith.constant 0 : i32
    %c0_i32_0 = arith.constant 0 : i32
    %c0_i32_1 = arith.constant 0 : i32
    return %c0_i32, %c0_i32_0 : i32, i32
  }
  func.func @transform_2(%arg0: i32) -> (i32, i32) {
    %c0_i32 = arith.constant 0 : i32
    %c0_i32_0 = arith.constant 0 : i32
    %c0_i32_1 = arith.constant 0 : i32
    return %c0_i32, %c0_i32_0 : i32, i32
  }
  func.func @transform_3(%arg0: i32) -> (i32, i32) {
    %c0_i32 = arith.constant 0 : i32
    %c0_i32_0 = arith.constant 0 : i32
    return %arg0, %c0_i32 : i32, i32
  }
  func.func @transform_4(%arg0: i32) -> (i32, i32) {
    %c0_i32 = arith.constant 0 : i32
    %c0_i32_0 = arith.constant 0 : i32
    return %arg0, %c0_i32 : i32, i32
  }
}

module attributes {stable_mosaic.version = 11 : i64} {
  func.func @_attention_kernel(%arg0: i32, %arg1: i32, %arg2: memref<16x16xi8, #tpu.memory_space<vmem>>, %arg3: memref<16x5xbf16, #tpu.memory_space<vmem>>, %arg4: memref<16x1xf32, #tpu.memory_space<vmem>>, %arg5: memref<1x16xf32, #tpu.memory_space<vmem>>, %arg6: memref<16x4xf32, #tpu.memory_space<vmem>>, %arg7: memref<16x5xf32, #tpu.memory_space<vmem>>) attributes {dimension_semantics = [#tpu.dimension_semantics<parallel>, #tpu.dimension_semantics<arbitrary>], iteration_bounds = array<i64: 1, 1>, scalar_prefetch = 0 : i64, scratch_operands = 1 : i64, tpu.core_type = #tpu.core_type<tc>, window_params = [{transform_indices = @transform_0, window_bounds = array<i64: 16, 16>}, {transform_indices = @transform_1, window_bounds = array<i64: 16, 5>}, {transform_indices = @transform_2, window_bounds = array<i64: 16, 1>}, {transform_indices = @transform_3, window_bounds = array<i64: 1, 16>}, {transform_indices = @transform_4, window_bounds = array<i64: 16, 4>}]} {
    %c0_i32 = arith.constant 0 : i32
    %0 = arith.cmpi eq, %arg1, %c0_i32 : i32
    %1 = arith.extui %0 : i1 to i32
    %c0_i32_0 = arith.constant 0 : i32
    %2 = arith.cmpi ne, %1, %c0_i32_0 : i32
    scf.if %2 {
      %cst_18 = arith.constant 0.000000e+00 : f32
      %30 = vector.broadcast %cst_18 : f32 to vector<16x5xf32>
      %c0_19 = arith.constant 0 : index
      %c0_20 = arith.constant 0 : index
      %31 = vector.load %arg7[%c0_19, %c0_20] : memref<16x5xf32, #tpu.memory_space<vmem>>, vector<16x5xf32>
      tpu.vector_store %arg7[%c0_19, %c0_20], %30 {strides = array<i32>} : memref<16x5xf32, #tpu.memory_space<vmem>>, vector<16x5xf32>,
    } else {
    }
    %c0 = arith.constant 0 : index
    %c0_1 = arith.constant 0 : index
    %3 = vector.load %arg2[%c0, %c0_1] : memref<16x16xi8, #tpu.memory_space<vmem>>, vector<16x16xi8>
    %c0_i8 = arith.constant 0 : i8
    %4 = vector.broadcast %c0_i8 : i8 to vector<16x16xi8>
    %5 = arith.cmpi ne, %3, %4 : vector<16x16xi8>
    %c0_2 = arith.constant 0 : index
    %c0_3 = arith.constant 0 : index
    %6 = vector.load %arg3[%c0_2, %c0_3] : memref<16x5xbf16, #tpu.memory_space<vmem>>, vector<16x5xbf16>
    %c0_4 = arith.constant 0 : index
    %c0_5 = arith.constant 0 : index
    %7 = vector.load %arg4[%c0_4, %c0_5] : memref<16x1xf32, #tpu.memory_space<vmem>>, vector<16x1xf32>
    %c0_6 = arith.constant 0 : index
    %c0_7 = arith.constant 0 : index
    %8 = vector.load %arg5[%c0_6, %c0_7] : memref<1x16xf32, #tpu.memory_space<vmem>>, vector<1x16xf32>
    %9 = vector.broadcast %7 : vector<16x1xf32> to vector<16x16xf32>
    %10 = vector.broadcast %8 : vector<1x16xf32> to vector<16x16xf32>
    %11 = arith.addf %9, %10 : vector<16x16xf32>
    %cst = arith.constant 0.000000e+00 : f32
    %12 = vector.broadcast %cst : f32 to vector<16x16xf32>
    %13 = arith.cmpf ogt, %11, %12 : vector<16x16xf32>
    %cst_8 = arith.constant 1.000000e-01 : f32
    %14 = vector.broadcast %cst_8 : f32 to vector<16x16xf32>
    %15 = arith.mulf %14, %11 : vector<16x16xf32>
    %16 = arith.select %13, %11, %15 : vector<16x16xi1>, vector<16x16xf32>
    %cst_9 = arith.constant 0.000000e+00 : f32
    %17 = vector.broadcast %cst_9 : f32 to vector<16x16xf32>
    %18 = arith.subf %17, %16 : vector<16x16xf32>
    %19 = math.exp %18 : vector<16x16xf32>
    %cst_10 = arith.constant 0.000000e+00 : f32
    %20 = vector.broadcast %cst_10 : f32 to vector<16x16xf32>
    %21 = arith.select %5, %19, %20 : vector<16x16xi1>, vector<16x16xf32>
    %22 = arith.truncf %21 : vector<16x16xf32> to vector<16x16xbf16>
    %cst_11 = arith.constant dense<0.000000e+00> : vector<16x5xf32>
    %23 = tpu.matmul %22, %6, %cst_11 {dimension_numbers = #tpu.dot_dimension_numbers<[1], [0], [0], [1], [0, 0, 1, 1], [], []>} : vector<16x16xbf16>, vector<16x5xbf16>, vector<16x5xf32> -> vector<16x5xf32>
    %c0_12 = arith.constant 0 : index
    %c0_13 = arith.constant 0 : index
    %24 = vector.load %arg7[%c0_12, %c0_13] : memref<16x5xf32, #tpu.memory_space<vmem>>, vector<16x5xf32>
    %25 = arith.addf %24, %23 : vector<16x5xf32>
    %c0_14 = arith.constant 0 : index
    %c0_15 = arith.constant 0 : index
    %26 = vector.load %arg7[%c0_14, %c0_15] : memref<16x5xf32, #tpu.memory_space<vmem>>, vector<16x5xf32>
    tpu.vector_store %arg7[%c0_14, %c0_15], %25 {strides = array<i32>} : memref<16x5xf32, #tpu.memory_space<vmem>>, vector<16x5xf32>,
    %c0_i32_16 = arith.constant 0 : i32
    %27 = arith.cmpi eq, %arg1, %c0_i32_16 : i32
    %28 = arith.extui %27 : i1 to i32
    %c0_i32_17 = arith.constant 0 : i32
    %29 = arith.cmpi ne, %28, %c0_i32_17 : i32
    scf.if %29 {
      %c0_18 = arith.constant 0 : index
      %c0_19 = arith.constant 0 : index
      %30 = vector.load %arg7[%c0_18, %c0_19] : memref<16x5xf32, #tpu.memory_space<vmem>>, vector<16x5xf32>
      %31 = vector.extract_strided_slice %30 {offsets = [0, 0], sizes = [16, 4], strides = [1, 1]} : vector<16x5xf32> to vector<16x4xf32>
      %32 = vector.extract_strided_slice %30 {offsets = [0, 4], sizes = [16, 1], strides = [1, 1]} : vector<16x5xf32> to vector<16x1xf32>
      %33 = vector.broadcast %32 : vector<16x1xf32> to vector<16x4xf32>
      %34 = arith.divf %31, %33 : vector<16x4xf32>
      %cst_20 = arith.constant 0.000000e+00 : f32
      %35 = vector.broadcast %cst_20 : f32 to vector<16x4xf32>
      %36 = arith.cmpf ogt, %34, %35 : vector<16x4xf32>
      %37 = math.exp %34 : vector<16x4xf32>
      %cst_21 = arith.constant 1.000000e+00 : f32
      %38 = vector.broadcast %cst_21 : f32 to vector<16x4xf32>
      %39 = arith.subf %37, %38 : vector<16x4xf32>
      %40 = arith.select %36, %34, %39 : vector<16x4xi1>, vector<16x4xf32>
      %cst_22 = arith.constant dense<0xFF800000> : vector<16xf32>
      %41 = vector.multi_reduction <maximumf>, %40, %cst_22 [1] : vector<16x4xf32> to vector<16xf32>
      %42 = vector.shape_cast %41 : vector<16xf32> to vector<16x1xf32>
      %43 = vector.broadcast %42 : vector<16x1xf32> to vector<16x4xf32>
      %44 = arith.subf %40, %43 : vector<16x4xf32>
      %45 = math.exp %44 : vector<16x4xf32>
      %cst_23 = arith.constant dense<0.000000e+00> : vector<16xf32>
      %46 = vector.multi_reduction <add>, %45, %cst_23 [1] : vector<16x4xf32> to vector<16xf32>
      %47 = vector.shape_cast %46 : vector<16xf32> to vector<16x1xf32>
      %48 = math.log %47 : vector<16x1xf32>
      %49 = vector.broadcast %48 : vector<16x1xf32> to vector<16x4xf32>
      %50 = arith.subf %44, %49 : vector<16x4xf32>
      %c0_24 = arith.constant 0 : index
      %c0_25 = arith.constant 0 : index
      %51 = vector.load %arg6[%c0_24, %c0_25] : memref<16x4xf32, #tpu.memory_space<vmem>>, vector<16x4xf32>
      tpu.vector_store %arg6[%c0_24, %c0_25], %50 {strides = array<i32>} : memref<16x4xf32, #tpu.memory_space<vmem>>, vector<16x4xf32>,
    } else {
    }
    return
  }
  func.func @transform_0(%arg0: i32, %arg1: i32) -> (i32, i32) {
    %c0_i32 = arith.constant 0 : i32
    return %arg0, %arg1 : i32, i32
  }
  func.func @transform_1(%arg0: i32, %arg1: i32) -> (i32, i32) {
    %c0_i32 = arith.constant 0 : i32
    %c0_i32_0 = arith.constant 0 : i32
    return %arg1, %c0_i32 : i32, i32
  }
  func.func @transform_2(%arg0: i32, %arg1: i32) -> (i32, i32) {
    %c0_i32 = arith.constant 0 : i32
    %c0_i32_0 = arith.constant 0 : i32
    return %arg0, %c0_i32 : i32, i32
  }
  func.func @transform_3(%arg0: i32, %arg1: i32) -> (i32, i32) {
    %c0_i32 = arith.constant 0 : i32
    %c0_i32_0 = arith.constant 0 : i32
    return %c0_i32, %arg1 : i32, i32
  }
  func.func @transform_4(%arg0: i32, %arg1: i32) -> (i32, i32) {
    %c0_i32 = arith.constant 0 : i32
    %c0_i32_0 = arith.constant 0 : i32
    return %arg0, %c0_i32 : i32, i32
  }
}

</mosaic_0001>

<bundles_post_ra>
// kernel: spgat_forward.4
= control target key start
LH: loop header
LB: loop body
LE: loop exit
PB: predicated region body
PF: predicated region fallthrough
CT: control target
= control target key end

     0   :  { %vm32_vm0 = vcmask 130048   ;;  %vm58_vm1 = vcmask 523264   ;;  %vm92_vm2 = vcmask 519168   ;;  %s194_s1 = inlined_call_operand.vmem [shape: bf16[16,64], index: 1, kind: input, shape index: {}]   ;;  %s195_s0 = inlined_call_operand.vmem [shape: bf16[16,16], index: 0, kind: input, shape index: {}]   ;;  %s196_s2 = inlined_call_operand.vmem [shape: f32[64,16], index: 2, kind: input, shape index: {}]   ;;  %s197_s3 = inlined_call_operand.vmem [shape: bf16[16,64], index: 3, kind: output, shape index: {0}]   ;;  %s198_s4 = inlined_call_operand.vmem [shape: f32[16,16], index: 4, kind: output, shape index: {1}]  }
   0x1   :  { %v115_v0 = vld [vmem:[%s194_s1] sm:$0xff]  ;;  %v57_v1 = vld [vmem:[%s196_s2 + $0x38] sm:$0xff]  ;;  %v56_v3 = vld [vmem:[%s196_s2 + $0x30] sm:$0xff] }
   0x2   :  { %v114_v2 = vld [vmem:[%s195_s0] sm:$0xff]  ;;  %73 = vmatpush.msra.mxu1 %v57_v1  ;;  %116 = vmatpush.msra.mxu2 %v57_v1  ;;  %v55_v4 = vld [vmem:[%s196_s2 + $0x28] sm:$0xff]  ;;  %v53_v6 = vld [vmem:[%s196_s2 + $0x18] sm:$0xff] }
   0x3   :  { %43 = vmatpush.bf16.msra.mxu0 %v115_v0  ;;  %v54_v5 = vld [vmem:[%s196_s2 + $0x20] sm:$0xff]  ;;  %v52_v7 = vld [vmem:[%s196_s2 + $0x10] sm:$0xff]  ;;  %v51_v8 = vld [vmem:[%s196_s2 + $0x8] sm:$0xff] }
   0x4   :  { %74 = vmatpush.msra.mxu1 %v56_v3  ;;  %117 = vmatpush.msra.mxu2 %v56_v3  ;;  %v50_v9 = vld [vmem:[%s196_s2] sm:$0xff] }
   0x6   :  { %111 = vmatmul.msk.bf16.vlgmr.msra.gmra.mxu0 %vm32_vm0, %v114_v2  ;;  %75 = vmatpush.msra.mxu1 %v55_v4 }
   0x7   :  { %118 = vmatpush.msra.mxu2 %v55_v4 }
   0x8   :  { %76 = vmatpush.msra.mxu1 %v54_v5 }
   0x9   :  { %119 = vmatpush.msra.mxu2 %v54_v5 }
   0xa   :  { %77 = vmatpush.msra.mxu1 %v53_v6 }
   0xb   :  { %120 = vmatpush.msra.mxu2 %v53_v6 }
   0xc   :  { %78 = vmatpush.msra.mxu1 %v52_v7 }
   0xd   :  { %121 = vmatpush.msra.mxu2 %v52_v7 }
   0xe   :  { %79 = vmatpush.msra.mxu1 %v51_v8 }
   0xf   :  { %122 = vmatpush.msra.mxu2 %v51_v8 }
  0x10   :  { %80 = vmatpush.msra.mxu1 %v50_v9 }
  0x11   :  { %123 = vmatpush.msra.mxu2 %v50_v9 }
  0x83   :  { %v45_v10 = vpop.f32.mrf.mxu0 }
  0x84   :  { %v90_v11 = vpack.c.bf16 %v45_v10, %v45_v10  ;;  %112 = vmatmul.msk.f32.vlgmr.msra.gmra.mxu1 %vm58_vm1, %v45_v10 }
  0x86   :  { %93 = vst.msk [vmem:[%s197_s3] sm:$0xf] %vm92_vm2, %v90_v11 }
  0x8b   :  { %v47_v12 = vpop.f32.mrf.mxu0 }
  0x8c   :  { %v91_v13 = vpack.c.bf16 %v47_v12, %v47_v12  ;;  %113 = vmatmul.msk.f32.vlgmr.msra.gmra.mxu2 %vm58_vm1, %v47_v12 }
  0x8e   :  { %94 = vst.msk [vmem:[%s197_s3 + $0x4] sm:$0xf] %vm92_vm2, %v91_v13 }
 0x101   :  { %v82_v14 = vpop.f32.mrf.mxu1 }
 0x102   :  { %88 = vst.msk [vmem:[%s198_s4] sm:$0xff] %vm32_vm0, %v82_v14 }
 0x10f   :  { %v85_v15 = vpop.f32.mrf.mxu2 }
 0x110   :  { %89 = vst.msk [vmem:[%s198_s4 + $0x8] sm:$0xff] %vm32_vm0, %v85_v15 }

// kernel: spgat_forward.6
= control target key start
LH: loop header
LB: loop body
LE: loop exit
PB: predicated region body
PF: predicated region fallthrough
CT: control target
= control target key end

     0   :  { %vm56_vm0 = vcmask 523264   ;;  %vm82_vm1 = vcmask 1043456   ;;  %vm75_vm2 = vcmask 31744   ;;  %vm114_vm3 = vcmask 27648   ;;  %s209_s1 = inlined_call_operand.vmem [shape: bf16[64,4], index: 1, kind: input, shape index: {}]   ;;  %s210_s0 = inlined_call_operand.vmem [shape: bf16[16,64], index: 0, kind: input, shape index: {}]   ;;  %s211_s2 = inlined_call_operand.vmem [shape: f32[4,2], index: 2, kind: input, shape index: {}]   ;;  %s212_s3 = inlined_call_operand.vmem [shape: bf16[16,4], index: 3, kind: output, shape index: {0}]   ;;  %s213_s4 = inlined_call_operand.vmem [shape: f32[16,2], index: 4, kind: output, shape index: {1}]  }
   0x1   :  { %v153_v0 = vld [vmem:[%s209_s1 + $0x18] sm:$0xff]  ;;  %v152_v1 = vld [vmem:[%s209_s1 + $0x10] sm:$0xff]  ;;  %v151_v2 = vld [vmem:[%s209_s1 + $0x8] sm:$0xff]  ;;  %vm109_vm4 = vcmask 15360  }
   0x2   :  { %64 = vmatpush.bf16.msra.mxu0 %v153_v0  ;;  %v150_v3 = vld [vmem:[%s209_s1] sm:$0xff] }
   0x3   :  { %v149_v4 = vld [vmem:[%s210_s0] sm:$0xff] }
   0x4   :  { %v74_v5 = vld [vmem:[%s211_s2] sm:$0xf] }
   0x5   :  { %146 = vmatpush.msk.msra.mxu1 %vm82_vm1, %v74_v5 }
   0x6   :  { %65 = vmatpush.bf16.msra.mxu0 %v152_v1 }
   0xa   :  { %66 = vmatpush.bf16.msra.mxu0 %v151_v2 }
   0xe   :  { %67 = vmatpush.bf16.msra.mxu0 %v150_v3 }
  0x11   :  { %145 = vmatmul.msk.bf16.vlgmr.msra.gmra.mxu0 %vm56_vm0, %v149_v4 }
  0x8e   :  { %v69_v6 = vpop.f32.mrf.mxu0 }
  0x8f   :  { %v112_v7 = vpack.c.bf16 %v69_v6, %v69_v6  ;;  %147 = vmatmul.msk.f32.vlgmr.msra.gmra.mxu1 %vm75_vm2, %v69_v6 }
  0x91   :  { %115 = vst.msk [vmem:[%s212_s3] sm:$0xf] %vm114_vm3, %v112_v7 }
  0x96   :  { %v71_v8 = vpop.f32.mrf.mxu0 }
  0x97   :  { %v113_v9 = vpack.c.bf16 %v71_v8, %v71_v8  ;;  %148 = vmatmul.msk.f32.gmra.mxu1 %vm75_vm2, %v71_v8 }
  0x99   :  { %116 = vst.msk [vmem:[%s212_s3 + $0x4] sm:$0xf] %vm114_vm3, %v113_v9 }
 0x10c   :  { %v103_v10 = vpop.f32.mrf.mxu1 }
 0x10d   :  { %110 = vst.msk [vmem:[%s213_s4] sm:$0xff] %vm109_vm4, %v103_v10 }
 0x114   :  { %v106_v11 = vpop.f32.mrf.mxu1 }
 0x115   :  { %111 = vst.msk [vmem:[%s213_s4 + $0x8] sm:$0xff] %vm109_vm4, %v106_v11 }

// kernel: spgat_forward.7
= control target key start
LH: loop header
LB: loop body
LE: loop exit
PB: predicated region body
PF: predicated region fallthrough
CT: control target
= control target key end

     0   :  { %v224_v0 = vmov 0   ;;  %vm24_vm0 = vcmask 39936   ;;  %v225_v5 = vmov 0.0   ;;  %vm78_vm7 = vcmask 130048   ;;  %s286_s2 = inlined_call_operand.vmem [shape: f32[16,1], index: 2, kind: input, shape index: {}]   ;;  %s287_s3 = inlined_call_operand.vmem [shape: f32[1,16], index: 3, kind: input, shape index: {}]   ;;  %s288_s1 = inlined_call_operand.vmem [shape: bf16[16,5], index: 1, kind: input, shape index: {}]   ;;  %s289_s0 = inlined_call_operand.vmem [shape: s8[16,16], index: 0, kind: input, shape index: {}]   ;;  %s290_s4 = inlined_call_operand.vmem [shape: f32[16,4], index: 4, kind: output, shape index: {}]  }
   0x1   :  { %200 = vset.pattern.permute.xlu0 %v224_v0  ;;  %v33_v1 = vld [vmem:[%s286_s2] sm:$0xff]  ;;  %v34_v2 = vld [vmem:[%s286_s2 + $0x8] sm:$0xff]  ;;  %25 = vst.msk [vmem:[#allocation2] sm:$0xff] %vm24_vm0, %v225_v5  ;;  %v226_v29 = vmov 4  }
   0x2   :  { %38 = vperm.xlu0 %200, %v33_v1   ;;  %v196_v3 = vld [vmem:[%s288_s1] sm:$0xff]  ;;  %26 = vst.msk [vmem:[#allocation2 + $0x8] sm:$0xff] %vm24_vm0, %v225_v5  ;;  %201 = vset.pattern.permute.xlu1 %v226_v29 }
   0x3   :  { %89 = vmatpush.bf16.msra.mxu0 %v196_v3  ;;  %v203_v4 = vld [vmem:[%s287_s3] ss:$0 sm:$0xff]  ;;  %v28_v15 = vld [vmem:[%s289_s0 + $0x2] sm:$0x3] }
   0x4   :  { %v27_v7 = vld [vmem:[%s289_s0] sm:$0x3]  ;;  %vm30_vm4 = vnez %v28_v15 }
   0x5   :  { %vm29_vm2 = vnez %v27_v7  ;;  %v64_v21 = vsel %vm30_vm4, 16843009, %v224_v0 }
   0x6   :  { %v63_v12 = vsel %vm29_vm2, 16843009, %v224_v0  ;;  %v66_v25 = vunpack.c.0.s8 %v64_v21 }
   0x7   :  { %v65_v17 = vunpack.c.0.s8 %v63_v12 }
   0x8   :  { %vm68_vm6 = vcmp.ne.s32.totalorder %v66_v25, 0  ;;  %v96_v30 = vld [vmem:[#allocation2] sm:$0xff] }
   0x9   :  { %vm67_vm5 = vcmp.ne.s32.totalorder %v65_v17, 0  ;;  %v97_v33 = vld [vmem:[#allocation2 + $0x8] sm:$0xff] }
   0xa   :  { %43 = vperm.xlu0 %200, %v34_v2  }
  0x12   :  { %202 = vset.pattern.permute.xlu0 %v226_v29 }
  0x74   :  { %v39_v6 = vpop.permute.xlu0 %38 }
  0x75   :  { %v49_v8 = vadd.f32 %v203_v4, %v39_v6 }
  0x77   :  { %vm51_vm1 = vcmp.gt.f32.partialorder %v49_v8, 0.0  ;;  %v53_v9 = vmul.f32 0.1, %v49_v8 }
  0x79   :  { %v55_v10 = vsel %vm51_vm1, %v49_v8, %v53_v9 }
  0x7a   :  { %v57_v11 = vsub.f32 0.0, %v55_v10 }
  0x7c   :  { %v59_v13 = vmul.f32 1.442695, %v57_v11  ;;  %v44_v14 = vpop.permute.xlu0 %43 }
  0x7d   :  { %v50_v16 = vadd.f32 %v203_v4, %v44_v14 }
  0x7e   :  { %204 = vpow2.f32 %v59_v13 }
  0x7f   :  { %vm52_vm3 = vcmp.gt.f32.partialorder %v50_v16, 0.0  ;;  %v54_v18 = vmul.f32 0.1, %v50_v16 }
  0x81   :  { %v56_v19 = vsel %vm52_vm3, %v50_v16, %v54_v18 }
  0x82   :  { %v58_v20 = vsub.f32 0.0, %v56_v19 }
  0x84   :  { %v205_v22 = vpop.eup %204  ;;  %v61_v23 = vmul.f32 1.442695, %v58_v20 }
  0x85   :  { %v69_v24 = vsel %vm67_vm5, %v205_v22, 0.0 }
  0x86   :  { %206 = vpow2.f32 %v61_v23 }
  0x8c   :  { %v207_v26 = vpop.eup %206 }
  0x8d   :  { %v70_v27 = vsel %vm68_vm6, %v207_v26, 0.0 }
  0x8e   :  { %v71_v28 = vpack.c.bf16 %v70_v27, %v69_v24 }
  0x90   :  { %193 = vmatmul.msk.bf16.vlgmr.msra.gmra.mxu0 %vm78_vm7, %v71_v28 }
 0x10d   :  { %v91_v31 = vpop.f32.mrf.mxu0 }
 0x10e   :  { %v98_v32 = vadd.f32 %v96_v30, %v91_v31 }
 0x110   :  { %101 = vst.msk [vmem:[#allocation2] sm:$0xff] %vm24_vm0, %v98_v32 }
 0x115   :  { %v93_v34 = vpop.f32.mrf.mxu0 }
 0x116   :  { %v99_v35 = vadd.f32 %v97_v33, %v93_v34 }
 0x117   :  { %v106_v36 = vld [vmem:[#allocation2] sm:$0xff] }
 0x118   :  { %102 = vst.msk [vmem:[#allocation2 + $0x8] sm:$0xff] %vm24_vm0, %v99_v35  ;;  %110 = vperm.xlu1 %201, %v106_v36   ;;  %vm158_vm0 = vcmask 31744  }
 0x11f   :  { %v107_v37 = vld [vmem:[#allocation2 + $0x8] sm:$0xff] }
 0x120   :  { %115 = vperm.xlu1 %201, %v107_v37  }
 0x18a   :  { %v111_v38 = vpop.permute.xlu1 %110 }
 0x18b   :  { %208 = vrcp.f32 %v111_v38  ;;  %v129_v43 = vand.u32 2147483648, %v111_v38  ;;  %v127_v45 = vand.u32 2147483647, %v111_v38  ;;  %vm123_vm9 = vweird.f32 %v111_v38 }
 0x18d   :  { %v130_v48 = vor.u32 1.1754944e-38, %v129_v43  ;;  %vm128_vm11 = vcmp.eq.f32.partialorder %v127_v45, 8.507059e+37 }
 0x191   :  { %v209_v39 = vpop.eup %208 }
 0x192   :  { %v119_v40 = vmul.f32 %v209_v39, %v111_v38  ;;  %v116_v41 = vpop.permute.xlu1 %115  ;;  %vm124_vm8 = vweird.f32 %v209_v39 }
 0x193   :  { %210 = vrcp.f32 %v116_v41  ;;  %vm125_vm10 = vmor %vm123_vm9, %vm124_vm8  ;;  %v144_v54 = vand.u32 2147483648, %v116_v41  ;;  %v142_v56 = vand.u32 2147483647, %v116_v41  ;;  %vm138_vm13 = vweird.f32 %v116_v41 }
 0x194   :  { %v120_v42 = vsub.f32 1.0, %v119_v40 }
 0x195   :  { %v145_v59 = vor.u32 1.1754944e-38, %v144_v54  ;;  %vm143_vm15 = vcmp.eq.f32.partialorder %v142_v56, 8.507059e+37 }
 0x196   :  { %v121_v44 = vmul.f32 %v209_v39, %v120_v42 }
 0x198   :  { %v122_v46 = vadd.f32 %v209_v39, %v121_v44 }
 0x199   :  { %v211_v47 = vpop.eup %210 }
 0x19a   :  { %v134_v49 = vmul.f32 %v211_v47, %v116_v41  ;;  %v126_v50 = vsel %vm125_vm10, %v209_v39, %v122_v46  ;;  %vm139_vm12 = vweird.f32 %v211_v47 }
 0x19b   :  { %v131_v51 = vsel %vm128_vm11, %v130_v48, %v126_v50  ;;  %vm140_vm14 = vmor %vm138_vm13, %vm139_vm12 }
 0x19c   :  { %v135_v52 = vsub.f32 1.0, %v134_v49  ;;  %v132_v53 = vmul.f32 %v131_v51, %v106_v36 }
 0x19e   :  { %v136_v55 = vmul.f32 %v211_v47, %v135_v52  ;;  %v150_v57 = vmul.f32 1.442695, %v132_v53  ;;  %vm148_vm1 = vcmp.gt.f32.partialorder %v132_v53, 0.0 }
 0x1a0   :  { %v137_v58 = vadd.f32 %v211_v47, %v136_v55  ;;  %212 = vpow2.f32 %v150_v57 }
 0x1a2   :  { %v141_v60 = vsel %vm140_vm14, %v211_v47, %v137_v58 }
 0x1a3   :  { %v146_v61 = vsel %vm143_vm15, %v145_v59, %v141_v60 }
 0x1a4   :  { %v147_v62 = vmul.f32 %v146_v61, %v107_v37 }
 0x1a6   :  { %v213_v63 = vpop.eup %212  ;;  %v152_v0 = vmul.f32 1.442695, %v147_v62  ;;  %vm149_vm2 = vcmp.gt.f32.partialorder %v147_v62, 0.0 }
 0x1a7   :  { %v194_v1 = vadd.f32 -1.0, %v213_v63 }
 0x1a8   :  { %214 = vpow2.f32 %v152_v0 }
 0x1a9   :  { %v156_v2 = vsel %vm148_vm1, %v132_v53, %v194_v1 }
 0x1aa   :  { %v159_v3 = vsel %vm158_vm0, %v156_v2, -inf }
 0x1ab   :  { %160 = vmax.xlane.f32.xlu2 %v159_v3 }
 0x1ae   :  { %v215_v4 = vpop.eup %214 }
 0x1af   :  { %v195_v5 = vadd.f32 -1.0, %v215_v4 }
 0x1b1   :  { %v157_v6 = vsel %vm149_vm2, %v147_v62, %v195_v5 }
 0x1b2   :  { %v162_v7 = vsel %vm158_vm0, %v157_v6, -inf }
 0x1b3   :  { %163 = vmax.xlane.f32.xlu2 %v162_v7 }
 0x21e   :  { %v161_v8 = vpop.xlane.xlu2 %160 }
 0x21f   :  { %v165_v9 = vsub.f32 %v156_v2, %v161_v8 }
 0x221   :  { %v167_v10 = vmul.f32 1.442695, %v165_v9 }
 0x223   :  { %216 = vpow2.f32 %v167_v10 }
 0x226   :  { %v164_v11 = vpop.xlane.xlu2 %163 }
 0x227   :  { %v166_v12 = vsub.f32 %v157_v6, %v164_v11 }
 0x229   :  { %v217_v13 = vpop.eup %216  ;;  %v169_v14 = vmul.f32 1.442695, %v166_v12 }
 0x22a   :  { %v171_v15 = vsel %vm158_vm0, %v217_v13, 0.0 }
 0x22b   :  { %218 = vpow2.f32 %v169_v14  ;;  %172 = vadd.xlane.f32.xlu0 %v171_v15 }
 0x231   :  { %v219_v16 = vpop.eup %218 }
 0x232   :  { %v174_v17 = vsel %vm158_vm0, %v219_v16, 0.0 }
 0x233   :  { %175 = vadd.xlane.f32.xlu1 %v174_v17 }
 0x29e   :  { %v173_v18 = vpop.xlane.xlu0 %172 }
 0x29f   :  { %220 = vlog2.f32 %v173_v18 }
 0x2a5   :  { %v221_v19 = vpop.eup %220 }
 0x2a6   :  { %v178_v20 = vmul.f32 0.6931472, %v221_v19  ;;  %v176_v21 = vpop.xlane.xlu1 %175 }
 0x2a7   :  { %222 = vlog2.f32 %v176_v21 }
 0x2a8   :  { %v181_v22 = vsub.f32 %v165_v9, %v178_v20 }
 0x2aa   :  { %183 = vst.msk [vmem:[%s290_s4] sm:$0xff] %vm158_vm0, %v181_v22 }
 0x2ad   :  { %v223_v23 = vpop.eup %222 }
 0x2ae   :  { %v180_v24 = vmul.f32 0.6931472, %v223_v23 }
 0x2b0   :  { %v182_v25 = vsub.f32 %v166_v12, %v180_v24 }
 0x2b2   :  { %184 = vst.msk [vmem:[%s290_s4 + $0x8] sm:$0xff] %vm158_vm0, %v182_v25 }

// kernel: spgat_forward.5
= control target key start
LH: loop header
LB: loop body
LE: loop exit
PB: predicated region body
PF: predicated region fallthrough
CT: control target
= control target key end

     0   :  { %v1166_v0 = vmov 3   ;;  %v1167_v1 = vmov 2   ;;  %v1168_v4 = vmov 0   ;;  %v1169_v6 = vmov 1   ;;  %s1170_s21 = smov 110   ;;  %s1176_s22 = smov 119   ;;  %s1763_s2 = inlined_call_operand.vmem [shape: f32[16,8], index: 2, kind: input, shape index: {}]   ;;  %s1764_s1 = inlined_call_operand.vmem [shape: bf16[16,72], index: 1, kind: input, shape index: {}]   ;;  %s1765_s3 = inlined_call_operand.vmem [shape: f32[8,16], index: 3, kind: input, shape index: {}]   ;;  %s1766_s0 = inlined_call_operand.vmem [shape: s8[16,16], index: 0, kind: input, shape index: {}]   ;;  %s1767_s4 = inlined_call_operand.vmem [shape: f32[16,64], index: 4, kind: output, shape index: {}]  }
   0x1   :  { %1042 = vset.pattern.permute.xlu1 %v1166_v0  ;;  %1041 = vset.pattern.permute.xlu0 %v1167_v1  ;;  %v33_v2 = vld [vmem:[%s1763_s2] sm:$0xff]  ;;  %v34_v5 = vld [vmem:[%s1763_s2 + $0x8] sm:$0xff]  ;;  %v1171_v7 = vmov 6   ;;  %v1173_v8 = vmov 4   ;;  %v1174_v9 = vmov 7   ;;  %s1175_s2 = smov 74  }
   0x2   :  { %187 = vperm.xlu1 %1042, %v33_v2   ;;  %141 = vperm.xlu0 %1041, %v33_v2   ;;  %v1002_v3 = vld [vmem:[%s1764_s1] sm:$0xff]  ;;  %s1172_s1 = smov 101   ;;  %v1177_v10 = vmov 5   ;;  %s1178_s23 = smov 83   ;;  %vm76_vm8 = vcmask 130048  }
   0x3   :  { %1043 = vset.pattern.permute.xlu2 %v1168_v4  ;;  %87 = vmatpush.bf16.msra.mxu0 %v1002_v3  ;;  %s1179_s24 = smov 92   ;;  %s1180_s25 = smov 65   ;;  %v1242_v11 = vld [vmem:[%s1765_s3] sm:$0xff] }
   0x4   :  { %38 = vperm.xlu2 %1043, %v33_v2   ;;  %v46_v12 = vperm.slane %v1242_v11, 0  ;;  %v27_v18 = vld [vmem:[%s1766_s0] sm:$0x3]  ;;  %v28_v21 = vld [vmem:[%s1766_s0 + $0x2] sm:$0x3]  ;;  %v194_v32 = vperm.slane %v1242_v11, 3 }
   0x5   :  { %vm29_vm1 = vnez %v27_v18  ;;  %vm30_vm3 = vnez %v28_v21  ;;  %v148_v33 = vperm.slane %v1242_v11, 2  ;;  %v332_v56 = vperm.slane %v1242_v11, 6  ;;  %s1181_s0 = smov 18   ;;  %s1182_s3 = smov 27  }
   0x6   :  { %v61_v25 = vsel %vm29_vm1, 16843009, %v1168_v4  ;;  %v62_v27 = vsel %vm30_vm3, 16843009, %v1168_v4  ;;  %s1183_s6 = smov 9   ;;  %s1184_s7 = smov 54  }
   0x7   :  { %v63_v30 = vunpack.c.0.s8 %v61_v25  ;;  %v64_v31 = vunpack.c.0.s8 %v62_v27  ;;  %s1185_s8 = smov 36   ;;  %s1186_s9 = smov 45  }
   0x8   :  { %s1187_s10 = smov 63   ;;  %s1197_s11 = smov 127  }
   0x9   :  { %vm1255_vm4 = vcmp.ne.s32.totalorder %v63_v30, 0  ;;  %vm1259_vm5 = vcmp.ne.s32.totalorder %v64_v31, 0  ;;  %v378_v31 = vperm.slane %v1242_v11, 7  ;;  %s1198_s12 = smov 126   ;;  %s1199_s13 = smov 125  }
   0xa   :  { %191 = vperm.xlu1 %1042, %v34_v5   ;;  %145 = vperm.xlu0 %1041, %v34_v5   ;;  %s1200_s14 = smov 122   ;;  %s1201_s15 = smov 124  }
   0xb   :  { %s1202_s16 = smov 123   ;;  %s1203_s17 = smov 121  }
   0xc   :  { %43 = vperm.xlu2 %1043, %v34_v5  }
  0x12   :  { %1045 = vset.pattern.permute.xlu1 %v1169_v6  ;;  %1044 = vset.pattern.permute.xlu0 %v1169_v6 }
  0x13   :  { %99 = vperm.xlu1 %1045, %v34_v5   ;;  %95 = vperm.xlu0 %1044, %v33_v2  }
  0x14   :  { %166 = vrot.lane.b32.xlu2 %v1002_v3, %s1170_s21 }
  0x15   :  { %1047 = vset.pattern.permute.xlu2 %v1171_v7 }
  0x1b   :  { %1046 = vset.pattern.permute.xlu1 %v1171_v7  ;;  %212 = vrot.lane.b32.xlu0 %v1002_v3, %s1172_s1 }
  0x1c   :  { %325 = vperm.xlu1 %1046, %v33_v2   ;;  %1050 = vset.pattern.permute.xlu0 %v1173_v8 }
  0x1d   :  { %329 = vperm.xlu2 %1047, %v34_v5  }
  0x23   :  { %233 = vperm.xlu0 %1050, %v33_v2  }
  0x24   :  { %1048 = vset.pattern.permute.xlu1 %v1174_v9 }
  0x25   :  { %371 = vperm.xlu1 %1048, %v33_v2   ;;  %1049 = vset.pattern.permute.xlu2 %v1174_v9 }
  0x26   :  { %375 = vperm.xlu2 %1049, %v34_v5  }
  0x2b   :  { %350 = vrot.lane.b32.xlu0 %v1002_v3, %s1175_s2 }
  0x2d   :  { %1051 = vset.pattern.permute.xlu1 %v1173_v8 }
  0x2e   :  { %237 = vperm.xlu1 %1051, %v34_v5   ;;  %120 = vrot.lane.b32.xlu2 %v1002_v3, %s1176_s22 }
  0x2f   :  { %1053 = vset.pattern.permute.xlu2 %v1177_v10 }
  0x33   :  { %304 = vrot.lane.b32.xlu0 %v1002_v3, %s1178_s23 }
  0x36   :  { %1052 = vset.pattern.permute.xlu1 %v1177_v10  ;;  %283 = vperm.xlu2 %1053, %v34_v5  }
  0x37   :  { %279 = vperm.xlu1 %1052, %v33_v2   ;;  %v102_v2 = vperm.slane %v1242_v11, 1 }
  0x3e   :  { %258 = vrot.lane.b32.xlu2 %v1002_v3, %s1179_s24 }
  0x3f   :  { %396 = vrot.lane.b32.xlu1 %v1002_v3, %s1180_s25 }
  0x5e   :  { %v39_v13 = vpop.permute.xlu2 %38 }
  0x5f   :  { %v47_v14 = vadd.f32 %v46_v12, %v39_v13 }
  0x61   :  { %vm49_vm0 = vcmp.gt.f32.partialorder %v47_v14, 0.0  ;;  %v51_v15 = vmul.f32 0.1, %v47_v14 }
  0x63   :  { %v53_v16 = vsel %vm49_vm0, %v47_v14, %v51_v15 }
  0x64   :  { %v55_v17 = vsub.f32 0.0, %v53_v16 }
  0x66   :  { %v44_v19 = vpop.permute.xlu2 %43  ;;  %v57_v22 = vmul.f32 1.442695, %v55_v17 }
  0x67   :  { %v48_v20 = vadd.f32 %v46_v12, %v44_v19 }
  0x68   :  { %1070 = vpow2.f32 %v57_v22 }
  0x69   :  { %vm50_vm2 = vcmp.gt.f32.partialorder %v48_v20, 0.0  ;;  %v52_v23 = vmul.f32 0.1, %v48_v20 }
  0x6b   :  { %v54_v24 = vsel %vm50_vm2, %v48_v20, %v52_v23 }
  0x6c   :  { %v56_v26 = vsub.f32 0.0, %v54_v24 }
  0x6e   :  { %v59_v28 = vmul.f32 1.442695, %v56_v26  ;;  %v167_v29 = vpop.permute.xlu2 %166  ;;  %v1071_v34 = vpop.eup %1070 }
  0x6f   :  { %179 = vmatpush.bf16.msra.mxu2 %v167_v29  ;;  %v67_v42 = vsel %vm1255_vm4, %v1071_v34, 0.0 }
  0x70   :  { %1072 = vpow2.f32 %v59_v28 }
  0x74   :  { %v188_v36 = vpop.permute.xlu1 %187  ;;  %v142_v37 = vpop.permute.xlu0 %141 }
  0x75   :  { %v195_v39 = vadd.f32 %v194_v32, %v188_v36  ;;  %v149_v40 = vadd.f32 %v148_v33, %v142_v37 }
  0x76   :  { %v1073_v41 = vpop.eup %1072 }
  0x77   :  { %vm197_vm6 = vcmp.gt.f32.partialorder %v195_v39, 0.0  ;;  %v199_v43 = vmul.f32 0.1, %v195_v39  ;;  %vm151_vm7 = vcmp.gt.f32.partialorder %v149_v40, 0.0  ;;  %v153_v44 = vmul.f32 0.1, %v149_v40  ;;  %v330_v45 = vpop.permute.xlu2 %329 }
  0x78   :  { %v68_v46 = vsel %vm1259_vm5, %v1073_v41, 0.0  ;;  %v334_v63 = vadd.f32 %v332_v56, %v330_v45 }
  0x79   :  { %v201_v47 = vsel %vm197_vm6, %v195_v39, %v199_v43  ;;  %v155_v48 = vsel %vm151_vm7, %v149_v40, %v153_v44  ;;  %v69_v49 = vpack.c.bf16 %v68_v46, %v67_v42  ;;  %v240_v43 = vperm.slane %v1242_v11, 4 }
  0x7a   :  { %v157_v50 = vsub.f32 0.0, %v155_v48  ;;  %v203_v51 = vsub.f32 0.0, %v201_v47  ;;  %v338_v8 = vmul.f32 0.1, %v334_v63  ;;  %vm336_vm11 = vcmp.gt.f32.partialorder %v334_v63, 0.0 }
  0x7b   :  { %978 = vmatmul.msk.bf16.vlgmr.msra.gmra.mxu0 %vm76_vm8, %v69_v49  ;;  %vm477_vm7 = vcmask 146432  }
  0x7c   :  { %v192_v52 = vpop.permute.xlu1 %191  ;;  %v146_v53 = vpop.permute.xlu0 %145  ;;  %v159_v57 = vmul.f32 1.442695, %v157_v50  ;;  %v205_v59 = vmul.f32 1.442695, %v203_v51  ;;  %v340_v16 = vsel %vm336_vm11, %v334_v63, %v338_v8  ;;  %vm486_vm11 = vcmask 367616  }
  0x7d   :  { %v196_v54 = vadd.f32 %v194_v32, %v192_v52  ;;  %v150_v55 = vadd.f32 %v148_v33, %v146_v53  ;;  %v342_v23 = vsub.f32 0.0, %v340_v16 }
  0x7e   :  { %1074 = vpow2.f32 %v159_v57 }
  0x7f   :  { %vm198_vm9 = vcmp.gt.f32.partialorder %v196_v54, 0.0  ;;  %v200_v58 = vmul.f32 0.1, %v196_v54  ;;  %vm152_vm10 = vcmp.gt.f32.partialorder %v150_v55, 0.0  ;;  %v154_v60 = vmul.f32 0.1, %v150_v55 }
  0x80   :  { %v376_v61 = vpop.permute.xlu2 %375  ;;  %1076 = vpow2.f32 %v205_v59  ;;  %v345_v39 = vmul.f32 1.442695, %v342_v23 }
  0x81   :  { %v202_v62 = vsel %vm198_vm9, %v196_v54, %v200_v58  ;;  %v156_v1 = vsel %vm152_vm10, %v150_v55, %v154_v60  ;;  %v380_v42 = vadd.f32 %v378_v31, %v376_v61  ;;  %vm480_vm9 = vcmask 220160  }
  0x82   :  { %v204_v0 = vsub.f32 0.0, %v202_v62  ;;  %v158_v3 = vsub.f32 0.0, %v156_v1  ;;  %v286_v62 = vperm.slane %v1242_v11, 5  ;;  %vm483_vm10 = vcmask 293888  }
  0x83   :  { %v384_v49 = vmul.f32 0.1, %v380_v42  ;;  %vm382_vm15 = vcmp.gt.f32.partialorder %v380_v42, 0.0 }
  0x84   :  { %v207_v4 = vmul.f32 1.442695, %v204_v0  ;;  %v161_v5 = vmul.f32 1.442695, %v158_v3  ;;  %v1075_v15 = vpop.eup %1074 }
  0x85   :  { %v100_v6 = vpop.permute.xlu1 %99  ;;  %v96_v7 = vpop.permute.xlu0 %95  ;;  %v163_v24 = vsel %vm1255_vm4, %v1075_v15, 0.0  ;;  %v386_v60 = vsel %vm382_vm15, %v380_v42, %v384_v49 }
  0x86   :  { %1078 = vpow2.f32 %v207_v4  ;;  %v104_v9 = vadd.f32 %v102_v2, %v100_v6  ;;  %v103_v10 = vadd.f32 %v102_v2, %v96_v7  ;;  %v1077_v17 = vpop.eup %1076  ;;  %v388_v1 = vsub.f32 0.0, %v386_v60 }
  0x87   :  { %1080 = vpow2.f32 %v161_v5  ;;  %v209_v29 = vsel %vm1255_vm4, %v1077_v17, 0.0 }
  0x88   :  { %vm106_vm12 = vcmp.gt.f32.partialorder %v104_v9, 0.0  ;;  %v108_v12 = vmul.f32 0.1, %v104_v9  ;;  %vm105_vm13 = vcmp.gt.f32.partialorder %v103_v10, 0.0  ;;  %v107_v13 = vmul.f32 0.1, %v103_v10  ;;  %v121_v14 = vpop.permute.xlu2 %120 }
  0x89   :  { %133 = vmatpush.bf16.msra.mxu1 %v121_v14  ;;  %v391_v11 = vmul.f32 1.442695, %v388_v1 }
  0x8a   :  { %v110_v18 = vsel %vm106_vm12, %v104_v9, %v108_v12  ;;  %v109_v19 = vsel %vm105_vm13, %v103_v10, %v107_v13  ;;  %vm492_vm12 = vcmask 515072   ;;  %vm489_vm13 = vcmask 441344  }
  0x8b   :  { %v112_v20 = vsub.f32 0.0, %v110_v18  ;;  %v111_v21 = vsub.f32 0.0, %v109_v19 }
  0x8c   :  { %v1079_v22 = vpop.eup %1078 }
  0x8d   :  { %v1081_v25 = vpop.eup %1080  ;;  %v115_v26 = vmul.f32 1.442695, %v112_v20  ;;  %v113_v27 = vmul.f32 1.442695, %v111_v21  ;;  %v213_v28 = vpop.permute.xlu0 %212  ;;  %v210_v30 = vsel %vm1259_vm5, %v1079_v22, 0.0 }
  0x8e   :  { %v326_v32 = vpop.permute.xlu1 %325  ;;  %225 = vmatpush.bf16.msra.mxu3 %v213_v28  ;;  %v164_v33 = vsel %vm1259_vm5, %v1081_v25, 0.0  ;;  %v211_v34 = vpack.c.bf16 %v210_v30, %v209_v29 }
  0x8f   :  { %1082 = vpow2.f32 %v115_v26  ;;  %v333_v36 = vadd.f32 %v332_v56, %v326_v32  ;;  %v165_v37 = vpack.c.bf16 %v164_v33, %v163_v24 }
  0x90   :  { %1084 = vpow2.f32 %v113_v27  ;;  %v284_v40 = vpop.permute.xlu2 %283 }
  0x91   :  { %vm335_vm14 = vcmp.gt.f32.partialorder %v333_v36, 0.0  ;;  %v337_v41 = vmul.f32 0.1, %v333_v36  ;;  %980 = vmatmul.msk.bf16.vlgmr.msra.gmra.mxu2 %vm76_vm8, %v165_v37  ;;  %981 = vmatmul.msk.bf16.vlgmr.msra.gmra.mxu3 %vm76_vm8, %v211_v34  ;;  %1086 = vpow2.f32 %v345_v39  ;;  %v288_v6 = vadd.f32 %v286_v62, %v284_v40 }
  0x93   :  { %v339_v44 = vsel %vm335_vm14, %v333_v36, %v337_v41  ;;  %v292_v14 = vmul.f32 0.1, %v288_v6  ;;  %vm290_vm3 = vcmp.gt.f32.partialorder %v288_v6, 0.0 }
  0x94   :  { %v341_v45 = vsub.f32 0.0, %v339_v44 }
  0x95   :  { %v1083_v46 = vpop.eup %1082  ;;  %v234_v47 = vpop.permute.xlu0 %233  ;;  %v294_v20 = vsel %vm290_vm3, %v288_v6, %v292_v14  ;;  %v1189_v6 = vmov 35  }
  0x96   :  { %v1085_v48 = vpop.eup %1084  ;;  %v343_v50 = vmul.f32 1.442695, %v341_v45  ;;  %v241_v51 = vadd.f32 %v240_v43, %v234_v47  ;;  %v118_v52 = vsel %vm1259_vm5, %v1083_v46, 0.0  ;;  %v296_v22 = vsub.f32 0.0, %v294_v20  ;;  %1057 = vset.pattern.permute.xlu1 %v1189_v6 }
  0x97   :  { %v372_v53 = vpop.permute.xlu1 %371  ;;  %v117_v54 = vsel %vm1255_vm4, %v1085_v48, 0.0  ;;  %v1087_v59 = vpop.eup %1086 }
  0x98   :  { %1088 = vpow2.f32 %v343_v50  ;;  %vm243_vm0 = vcmp.gt.f32.partialorder %v241_v51, 0.0  ;;  %v245_v55 = vmul.f32 0.1, %v241_v51  ;;  %v379_v56 = vadd.f32 %v378_v31, %v372_v53  ;;  %v259_v57 = vpop.permute.xlu2 %258 }
  0x99   :  { %v119_v58 = vpack.c.bf16 %v118_v52, %v117_v54  ;;  %271 = vmatpush.bf16.msrb.mxu0 %v259_v57  ;;  %v348_v3 = vsel %vm1259_vm5, %v1087_v59, 0.0  ;;  %1090 = vpow2.f32 %v391_v11  ;;  %v299_v29 = vmul.f32 1.442695, %v296_v22 }
  0x9a   :  { %vm381_vm1 = vcmp.gt.f32.partialorder %v379_v56, 0.0  ;;  %v383_v61 = vmul.f32 0.1, %v379_v56  ;;  %v247_v63 = vsel %vm243_vm0, %v241_v51, %v245_v55 }
  0x9b   :  { %979 = vmatmul.msk.bf16.vlgmr.msra.gmra.mxu1 %vm76_vm8, %v119_v58  ;;  %v249_v5 = vsub.f32 0.0, %v247_v63  ;;  %v1188_v63 = vmov 0.0  }
  0x9c   :  { %v385_v0 = vsel %vm381_vm1, %v379_v56, %v383_v61 }
  0x9d   :  { %v351_v2 = vpop.permute.xlu0 %350  ;;  %v387_v7 = vsub.f32 0.0, %v385_v0  ;;  %v251_v13 = vmul.f32 1.442695, %v249_v5 }
  0x9e   :  { %v1089_v4 = vpop.eup %1088  ;;  %363 = vmatpush.bf16.msrb.mxu2 %v351_v2 }
  0x9f   :  { %v347_v8 = vsel %vm1255_vm4, %v1089_v4, 0.0  ;;  %v389_v15 = vmul.f32 1.442695, %v387_v7  ;;  %1092 = vpow2.f32 %v251_v13  ;;  %v1091_v25 = vpop.eup %1090  ;;  %v1190_v7 = vmov 8  }
  0xa0   :  { %v238_v9 = vpop.permute.xlu1 %237  ;;  %v349_v10 = vpack.c.bf16 %v348_v3, %v347_v8  ;;  %v394_v36 = vsel %vm1259_vm5, %v1091_v25, 0.0  ;;  %1054 = vset.pattern.permute.xlu0 %v1190_v7  ;;  %v1191_v8 = vmov 17  }
  0xa1   :  { %v242_v12 = vadd.f32 %v240_v43, %v238_v9  ;;  %1094 = vpow2.f32 %v389_v15  ;;  %1055 = vset.pattern.permute.xlu2 %v1191_v8 }
  0xa2   :  { %984 = vmatmul.msk.bf16.vlgmr.msrb.gmra.mxu2 %vm76_vm8, %v349_v10 }
  0xa3   :  { %vm244_vm2 = vcmp.gt.f32.partialorder %v242_v12, 0.0  ;;  %v246_v16 = vmul.f32 0.1, %v242_v12 }
  0xa5   :  { %v248_v17 = vsel %vm244_vm2, %v242_v12, %v246_v16  ;;  %v305_v18 = vpop.permute.xlu0 %304  ;;  %v1093_v26 = vpop.eup %1092 }
  0xa6   :  { %v250_v19 = vsub.f32 0.0, %v248_v17  ;;  %317 = vmatpush.bf16.msrb.mxu1 %v305_v18  ;;  %v255_v32 = vsel %vm1255_vm4, %v1093_v26, 0.0 }
  0xa7   :  { %v1095_v28 = vpop.eup %1094 }
  0xa8   :  { %v253_v21 = vmul.f32 1.442695, %v250_v19  ;;  %v393_v34 = vsel %vm1255_vm4, %v1095_v28, 0.0 }
  0xa9   :  { %v280_v23 = vpop.permute.xlu1 %279  ;;  %v395_v42 = vpack.c.bf16 %v394_v36, %v393_v34  ;;  %v1192_v36 = vmov 44  }
  0xaa   :  { %1096 = vpow2.f32 %v253_v21  ;;  %v287_v24 = vadd.f32 %v286_v62, %v280_v23 }
  0xab   :  { %1098 = vpow2.f32 %v299_v29 }
  0xac   :  { %vm289_vm6 = vcmp.gt.f32.partialorder %v287_v24, 0.0  ;;  %v291_v27 = vmul.f32 0.1, %v287_v24 }
  0xae   :  { %v293_v30 = vsel %vm289_vm6, %v287_v24, %v291_v27 }
  0xaf   :  { %v295_v31 = vsub.f32 0.0, %v293_v30 }
  0xb0   :  { %v1097_v33 = vpop.eup %1096 }
  0xb1   :  { %v297_v37 = vmul.f32 1.442695, %v295_v31  ;;  %v397_v39 = vpop.permute.xlu1 %396  ;;  %v256_v40 = vsel %vm1259_vm5, %v1097_v33, 0.0  ;;  %v1099_v43 = vpop.eup %1098 }
  0xb2   :  { %409 = vmatpush.bf16.msrb.mxu3 %v397_v39  ;;  %v257_v41 = vpack.c.bf16 %v256_v40, %v255_v32  ;;  %v302_v46 = vsel %vm1259_vm5, %v1099_v43, 0.0  ;;  %vm474_vm5 = vcmask 72704   ;;  %v1194_v39 = vmov 26  }
  0xb3   :  { %1100 = vpow2.f32 %v297_v37  ;;  %v1193_v37 = vmov 53  }
  0xb4   :  { %982 = vmatmul.msk.bf16.vlgmr.msrb.gmra.mxu0 %vm76_vm8, %v257_v41  ;;  %v1195_v41 = vmov 62  }
  0xb5   :  { %985 = vmatmul.msk.bf16.vlgmr.msrb.gmra.mxu3 %vm76_vm8, %v395_v42  ;;  %v1196_v42 = vmov 71  }
  0xb9   :  { %v1101_v44 = vpop.eup %1100 }
  0xba   :  { %v301_v45 = vsel %vm1255_vm4, %v1101_v44, 0.0  ;;  %vm24_vm4 = vcmask 588800  }
  0xbb   :  { %v303_v47 = vpack.c.bf16 %v302_v46, %v301_v45  ;;  %25 = vst.msk [vmem:[#allocation2] sm:$0xff] %vm24_vm4, %v1188_v63 }
  0xbc   :  { %26 = vst.msk [vmem:[#allocation2 + $0x8] sm:$0xff] %vm24_vm4, %v1188_v63 }
  0xbd   :  { %983 = vmatmul.msk.bf16.vlgmr.msrb.gmra.mxu1 %vm76_vm8, %v303_v47 }
  0xc2   :  { %v416_v29 = vld [vmem:[#allocation2] sm:$0xff] }
  0xc3   :  { %v417_v21 = vld [vmem:[#allocation2 + $0x8] sm:$0xff] }
  0xf8   :  { %v89_v35 = vpop.f32.mrf.mxu0 }
 0x100   :  { %v91_v54 = vpop.f32.mrf.mxu0 }
 0x114   :  { %v181_v48 = vpop.f32.mrf.mxu2  ;;  %v227_v49 = vpop.f32.mrf.mxu3 }
 0x115   :  { %428 = vrot.lane.b32.xlu0 %v181_v48, %s1181_s0  ;;  %436 = vrot.lane.b32.xlu2 %v227_v49, %s1182_s3 }
 0x118   :  { %v135_v50 = vpop.f32.mrf.mxu1 }
 0x119   :  { %420 = vrot.lane.b32.xlu1 %v135_v50, %s1183_s6 }
 0x11c   :  { %v183_v51 = vpop.f32.mrf.mxu2  ;;  %v229_v52 = vpop.f32.mrf.mxu3 }
 0x11d   :  { %438 = vrot.lane.b32.xlu0 %v229_v52, %s1182_s3 }
 0x120   :  { %v137_v53 = vpop.f32.mrf.mxu1 }
 0x121   :  { %430 = vrot.lane.b32.xlu1 %v183_v51, %s1181_s0  ;;  %422 = vrot.lane.b32.xlu2 %v137_v53, %s1183_s6 }
 0x125   :  { %v365_v38 = vpop.f32.mrf.mxu2 }
 0x129   :  { %460 = vrot.lane.b32.xlu2 %v365_v38, %s1184_s7 }
 0x12d   :  { %v367_v60 = vpop.f32.mrf.mxu2 }
 0x131   :  { %v273_v55 = vpop.f32.mrf.mxu0 }
 0x132   :  { %444 = vrot.lane.b32.xlu1 %v273_v55, %s1185_s8 }
 0x138   :  { %v411_v56 = vpop.f32.mrf.mxu3 }
 0x139   :  { %v275_v57 = vpop.f32.mrf.mxu0 }
 0x13a   :  { %v319_v58 = vpop.f32.mrf.mxu1  ;;  %446 = vrot.lane.b32.xlu2 %v275_v57, %s1185_s8 }
 0x13b   :  { %452 = vrot.lane.b32.xlu0 %v319_v58, %s1186_s9 }
 0x140   :  { %v413_v59 = vpop.f32.mrf.mxu3 }
 0x142   :  { %v321_v61 = vpop.f32.mrf.mxu1  ;;  %470 = vrot.lane.b32.xlu2 %v413_v59, %s1187_s10 }
 0x143   :  { %462 = vrot.lane.b32.xlu0 %v367_v60, %s1184_s7  ;;  %454 = vrot.lane.b32.xlu1 %v321_v61, %s1186_s9 }
 0x14b   :  { %468 = vrot.lane.b32.xlu1 %v411_v56, %s1187_s10 }
 0x16f   :  { %v437_v62 = vpop.permute.xlu2 %436 }
 0x17b   :  { %v423_v0 = vpop.permute.xlu2 %422 }
 0x17c   :  { %v476_v12 = vsel %vm474_vm5, %v91_v54, %v423_v0 }
 0x183   :  { %v461_v3 = vpop.permute.xlu2 %460 }
 0x187   :  { %v429_v1 = vpop.permute.xlu0 %428 }
 0x18b   :  { %v421_v2 = vpop.permute.xlu1 %420 }
 0x18c   :  { %v475_v14 = vsel %vm474_vm5, %v89_v35, %v421_v2 }
 0x18d   :  { %v478_v16 = vsel %vm477_vm7, %v475_v14, %v429_v1 }
 0x18e   :  { %v481_v24 = vsel %vm480_vm9, %v478_v16, %v437_v62 }
 0x18f   :  { %v439_v4 = vpop.permute.xlu0 %438 }
 0x193   :  { %v431_v5 = vpop.permute.xlu1 %430 }
 0x194   :  { %v447_v9 = vpop.permute.xlu2 %446  ;;  %v479_v13 = vsel %vm477_vm7, %v476_v12, %v431_v5 }
 0x195   :  { %v482_v15 = vsel %vm480_vm9, %v479_v13, %v439_v4 }
 0x196   :  { %v485_v17 = vsel %vm483_vm10, %v482_v15, %v447_v9 }
 0x19c   :  { %v471_v22 = vpop.permute.xlu2 %470 }
 0x1a4   :  { %v445_v10 = vpop.permute.xlu1 %444 }
 0x1a5   :  { %v484_v26 = vsel %vm483_vm10, %v481_v24, %v445_v10 }
 0x1ad   :  { %v453_v11 = vpop.permute.xlu0 %452 }
 0x1ae   :  { %v487_v28 = vsel %vm486_vm11, %v484_v26, %v453_v11 }
 0x1af   :  { %v490_v30 = vsel %vm489_vm13, %v487_v28, %v461_v3 }
 0x1b5   :  { %v463_v18 = vpop.permute.xlu0 %462  ;;  %v455_v19 = vpop.permute.xlu1 %454 }
 0x1b6   :  { %v488_v20 = vsel %vm486_vm11, %v485_v17, %v455_v19 }
 0x1b7   :  { %v491_v23 = vsel %vm489_vm13, %v488_v20, %v463_v18 }
 0x1b8   :  { %v494_v25 = vsel %vm492_vm12, %v491_v23, %v471_v22 }
 0x1b9   :  { %v496_v27 = vadd.f32 %v494_v25, %v417_v21 }
 0x1bb   :  { %499 = vst.msk [vmem:[#allocation2 + $0x8] sm:$0xff] %vm24_vm4, %v496_v27 }
 0x1bd   :  { %v469_v31 = vpop.permute.xlu1 %468 }
 0x1be   :  { %v493_v32 = vsel %vm492_vm12, %v490_v30, %v469_v31 }
 0x1bf   :  { %v495_v33 = vadd.f32 %v493_v32, %v416_v29 }
 0x1c1   :  { %498 = vst.msk [vmem:[#allocation2] sm:$0xff] %vm24_vm4, %v495_v33 }
 0x1c2   :  { %v1320_v40 = vld [vmem:[#allocation2 + $0x8] sm:$0xff] }
 0x1c8   :  { %v1312_v34 = vld [vmem:[#allocation2] sm:$0xff] }
 0x1c9   :  { %652 = vperm.xlu1 %1057, %v1312_v34   ;;  %507 = vperm.xlu0 %1054, %v1312_v34  }
 0x1ca   :  { %556 = vperm.xlu2 %1055, %v1312_v34  }
 0x1d1   :  { %1058 = vset.pattern.permute.xlu1 %v1192_v36  ;;  %1059 = vset.pattern.permute.xlu0 %v1193_v37 }
 0x1d2   :  { %1056 = vset.pattern.permute.xlu2 %v1194_v39  ;;  %700 = vperm.xlu1 %1058, %v1312_v34  }
 0x1d3   :  { %748 = vperm.xlu0 %1059, %v1312_v34   ;;  %604 = vperm.xlu2 %1056, %v1312_v34  }
 0x1da   :  { %1061 = vset.pattern.permute.xlu1 %v1190_v7 }
 0x1db   :  { %1063 = vset.pattern.permute.xlu0 %v1194_v39  ;;  %1060 = vset.pattern.permute.xlu2 %v1195_v41 }
 0x1dc   :  { %796 = vperm.xlu2 %1060, %v1312_v34   ;;  %608 = vperm.xlu0 %1063, %v1320_v40  }
 0x1dd   :  { %512 = vperm.xlu1 %1061, %v1320_v40  }
 0x1e4   :  { %1064 = vset.pattern.permute.xlu2 %v1189_v6  ;;  %1069 = vset.pattern.permute.xlu0 %v1196_v42 }
 0x1e5   :  { %1062 = vset.pattern.permute.xlu1 %v1191_v8  ;;  %656 = vperm.xlu2 %1064, %v1320_v40  }
 0x1e6   :  { %848 = vperm.xlu0 %1069, %v1320_v40   ;;  %560 = vperm.xlu1 %1062, %v1320_v40  }
 0x1ed   :  { %1065 = vset.pattern.permute.xlu2 %v1192_v36 }
 0x1ee   :  { %1066 = vset.pattern.permute.xlu1 %v1193_v37  ;;  %704 = vperm.xlu2 %1065, %v1320_v40  }
 0x1ef   :  { %752 = vperm.xlu1 %1066, %v1320_v40  }
 0x1f6   :  { %1068 = vset.pattern.permute.xlu2 %v1196_v42 }
 0x1f7   :  { %1067 = vset.pattern.permute.xlu1 %v1195_v41  ;;  %844 = vperm.xlu2 %1068, %v1312_v34  }
 0x1f8   :  { %800 = vperm.xlu1 %1067, %v1320_v40  }
 0x224   :  { %v557_v43 = vpop.permute.xlu2 %556 }
 0x225   :  { %1102 = vrcp.f32 %v557_v43  ;;  %v574_v48 = vand.u32 2147483648, %v557_v43  ;;  %v572_v50 = vand.u32 2147483647, %v557_v43  ;;  %vm568_vm15 = vweird.f32 %v557_v43 }
 0x227   :  { %v575_v52 = vor.u32 1.1754944e-38, %v574_v48  ;;  %vm573_vm1 = vcmp.eq.f32.partialorder %v572_v50, 8.507059e+37 }
 0x22b   :  { %v1103_v44 = vpop.eup %1102 }
 0x22c   :  { %v564_v45 = vmul.f32 %v1103_v44, %v557_v43  ;;  %vm569_vm14 = vweird.f32 %v1103_v44 }
 0x22d   :  { %v605_v46 = vpop.permute.xlu2 %604  ;;  %vm570_vm0 = vmor %vm568_vm15, %vm569_vm14 }
 0x22e   :  { %v565_v47 = vsub.f32 1.0, %v564_v45  ;;  %1104 = vrcp.f32 %v605_v46  ;;  %v622_v63 = vand.u32 2147483648, %v605_v46  ;;  %vm616_vm3 = vweird.f32 %v605_v46 }
 0x22f   :  { %v620_v0 = vand.u32 2147483647, %v605_v46 }
 0x230   :  { %v566_v49 = vmul.f32 %v1103_v44, %v565_v47  ;;  %v623_v8 = vor.u32 1.1754944e-38, %v622_v63 }
 0x231   :  { %vm621_vm5 = vcmp.eq.f32.partialorder %v620_v0, 8.507059e+37 }
 0x232   :  { %v567_v51 = vadd.f32 %v1103_v44, %v566_v49 }
 0x234   :  { %v1105_v35 = vpop.eup %1104  ;;  %v571_v53 = vsel %vm570_vm0, %v1103_v44, %v567_v51 }
 0x235   :  { %v612_v38 = vmul.f32 %v1105_v35, %v605_v46  ;;  %v576_v54 = vsel %vm573_vm1, %v575_v52, %v571_v53  ;;  %vm617_vm2 = vweird.f32 %v1105_v35 }
 0x236   :  { %v1332_v55 = vpop.permute.xlu2 %796  ;;  %v577_v56 = vmul.f32 %v576_v54, %v1312_v34  ;;  %vm1340_vm6 = vmor %vm616_vm3, %vm617_vm2 }
 0x237   :  { %v613_v57 = vsub.f32 1.0, %v612_v38  ;;  %v812_v30 = vand.u32 2147483647, %v1332_v55  ;;  %v814_v41 = vand.u32 2147483648, %v1332_v55  ;;  %vm808_vm13 = vweird.f32 %v1332_v55 }
 0x238   :  { %v595_v58 = vmul.f32 1.442695, %v577_v56  ;;  %vm593_vm4 = vcmp.gt.f32.partialorder %v577_v56, 0.0 }
 0x239   :  { %v614_v59 = vmul.f32 %v1105_v35, %v613_v57  ;;  %vm1397_vm14 = vcmp.eq.f32.partialorder %v812_v30, 8.507059e+37  ;;  %v815_v53 = vor.u32 1.1754944e-38, %v814_v41 }
 0x23a   :  { %1106 = vpow2.f32 %v595_v58 }
 0x23b   :  { %1108 = vrcp.f32 %v1332_v55  ;;  %v653_v60 = vpop.permute.xlu1 %652  ;;  %v1336_v61 = vpop.permute.xlu0 %507  ;;  %v615_v62 = vadd.f32 %v1105_v35, %v614_v59 }
 0x23c   :  { %1110 = vrcp.f32 %v653_v60  ;;  %v670_v19 = vand.u32 2147483648, %v653_v60  ;;  %vm664_vm9 = vweird.f32 %v653_v60  ;;  %v668_v22 = vand.u32 2147483647, %v653_v60 }
 0x23d   :  { %v619_v6 = vsel %vm1340_vm6, %v1105_v35, %v615_v62 }
 0x23e   :  { %v624_v13 = vsel %vm621_vm5, %v623_v8, %v619_v6  ;;  %v671_v29 = vor.u32 1.1754944e-38, %v670_v19  ;;  %vm669_vm11 = vcmp.eq.f32.partialorder %v668_v22, 8.507059e+37 }
 0x23f   :  { %v1338_v1 = vpop.permute.xlu2 %656  ;;  %v1359_v17 = vmul.f32 %v624_v13, %v1312_v34 }
 0x240   :  { %v1107_v2 = vpop.eup %1106  ;;  %1112 = vrcp.f32 %v1338_v1  ;;  %v685_v42 = vand.u32 2147483648, %v1338_v1  ;;  %v683_v38 = vand.u32 2147483647, %v1338_v1 }
 0x241   :  { %v1344_v4 = vpop.eup %1108  ;;  %v988_v5 = vadd.f32 -1.0, %v1107_v2  ;;  %v643_v25 = vmul.f32 1.442695, %v1359_v17  ;;  %vm641_vm0 = vcmp.gt.f32.partialorder %v1359_v17, 0.0 }
 0x242   :  { %v1111_v7 = vpop.eup %1110  ;;  %v804_v11 = vmul.f32 %v1344_v4, %v1332_v55  ;;  %vm809_vm12 = vweird.f32 %v1344_v4  ;;  %v1407_v54 = vor.u32 1.1754944e-38, %v685_v42 }
 0x243   :  { %v660_v9 = vmul.f32 %v1111_v7, %v653_v60  ;;  %v601_v10 = vsel %vm593_vm4, %v577_v56, %v988_v5  ;;  %vm665_vm7 = vweird.f32 %v1111_v7  ;;  %vm1402_vm15 = vmor %vm808_vm13, %vm809_vm12  ;;  %vm679_vm4 = vweird.f32 %v1338_v1 }
 0x244   :  { %893 = vrot.lane.b32.xlu1 %v601_v10, %s1197_s11  ;;  %v1352_v12 = vpop.permute.xlu1 %700  ;;  %v805_v18 = vsub.f32 1.0, %v804_v11  ;;  %vm666_vm10 = vmor %vm664_vm9, %vm665_vm7 }
 0x245   :  { %v661_v14 = vsub.f32 1.0, %v660_v9  ;;  %1114 = vrcp.f32 %v1352_v12  ;;  %v1355_v15 = vpop.permute.xlu0 %748  ;;  %v718_v45 = vand.u32 2147483648, %v1352_v12  ;;  %v716_v51 = vand.u32 2147483647, %v1352_v12 }
 0x246   :  { %1116 = vrcp.f32 %v1355_v15  ;;  %v1364_v23 = vpop.eup %1112  ;;  %v806_v28 = vmul.f32 %v1344_v4, %v805_v18  ;;  %vm712_vm1 = vweird.f32 %v1352_v12  ;;  %v764_v57 = vand.u32 2147483647, %v1355_v15 }
 0x247   :  { %v662_v16 = vmul.f32 %v1111_v7, %v661_v14  ;;  %v675_v32 = vmul.f32 %v1364_v23, %v1338_v1  ;;  %v1411_v56 = vor.u32 1.1754944e-38, %v718_v45  ;;  %vm760_vm2 = vweird.f32 %v1355_v15 }
 0x248   :  { %v1361_v20 = vpop.permute.xlu2 %704  ;;  %v807_v44 = vadd.f32 %v1344_v4, %v806_v28  ;;  %vm680_vm3 = vweird.f32 %v1364_v23  ;;  %vm1426_vm6 = vcmp.eq.f32.partialorder %v716_v51, 8.507059e+37  ;;  %v766_v6 = vand.u32 2147483648, %v1355_v15 }
 0x249   :  { %v663_v21 = vadd.f32 %v1111_v7, %v662_v16  ;;  %1118 = vrcp.f32 %v1361_v20  ;;  %v676_v50 = vsub.f32 1.0, %v675_v32  ;;  %v733_v11 = vand.u32 2147483648, %v1361_v20 }
 0x24a   :  { %1120 = vpow2.f32 %v643_v25  ;;  %v811_v58 = vsel %vm1402_vm15, %v1344_v4, %v807_v44  ;;  %vm1459_vm7 = vcmp.eq.f32.partialorder %v764_v57, 8.507059e+37  ;;  %v767_v25 = vor.u32 1.1754944e-38, %v766_v6 }
 0x24b   :  { %v1366_v24 = vpop.eup %1114  ;;  %v667_v26 = vsel %vm666_vm10, %v1111_v7, %v663_v21  ;;  %v677_v3 = vmul.f32 %v1364_v23, %v676_v50  ;;  %v731_v7 = vand.u32 2147483647, %v1361_v20  ;;  %v816_v10 = vsel %vm1397_vm14, %v815_v53, %v811_v58 }
 0x24c   :  { %v1369_v27 = vpop.eup %1116  ;;  %v708_v31 = vmul.f32 %v1366_v24, %v1352_v12  ;;  %v672_v37 = vsel %vm669_vm11, %v671_v29, %v667_v26  ;;  %vm713_vm5 = vweird.f32 %v1366_v24  ;;  %v1454_v19 = vmul.f32 %v816_v10, %v1312_v34 }
 0x24d   :  { %v756_v33 = vmul.f32 %v1369_v27, %v1355_v15  ;;  %v1395_v48 = vmul.f32 %v672_v37, %v1312_v34  ;;  %v1457_v21 = vadd.f32 %v1364_v23, %v677_v3  ;;  %vm727_vm9 = vweird.f32 %v1361_v20  ;;  %vm1475_vm12 = vmor %vm712_vm1, %vm713_vm5 }
 0x24e   :  { %v1379_v36 = vpop.permute.xlu0 %608  ;;  %v709_v46 = vsub.f32 1.0, %v708_v31  ;;  %vm761_vm10 = vweird.f32 %v1369_v27  ;;  %vm1467_vm11 = vcmp.eq.f32.partialorder %v683_v38, 8.507059e+37  ;;  %vm1480_vm14 = vcmp.eq.f32.partialorder %v731_v7, 8.507059e+37 }
 0x24f   :  { %v1381_v39 = vpop.eup %1118  ;;  %1122 = vrcp.f32 %v1379_v36  ;;  %v1386_v43 = vpop.permute.xlu1 %512  ;;  %v757_v52 = vsub.f32 1.0, %v756_v33  ;;  %v691_v2 = vmul.f32 1.442695, %v1395_v48  ;;  %v637_v13 = vand.u32 2147483648, %v1379_v36  ;;  %vm1499_vm15 = vmor %vm760_vm2, %vm761_vm10 }
 0x250   :  { %v723_v47 = vmul.f32 %v1381_v39, %v1361_v20  ;;  %v1121_v55 = vpop.eup %1120  ;;  %v710_v60 = vmul.f32 %v1366_v24, %v709_v46  ;;  %vm728_vm13 = vweird.f32 %v1381_v39  ;;  %v734_v32 = vor.u32 1.1754944e-38, %v733_v11 }
 0x251   :  { %v990_v63 = vadd.f32 -1.0, %v1121_v55  ;;  %v1421_v0 = vpop.permute.xlu2 %844  ;;  %v758_v4 = vmul.f32 %v1369_v27, %v757_v52  ;;  %1124 = vpow2.f32 %v691_v2  ;;  %v635_v33 = vand.u32 2147483647, %v1379_v36  ;;  %vm1519_vm1 = vmor %vm727_vm9, %vm728_vm13 }
 0x252   :  { %v724_v62 = vsub.f32 1.0, %v723_v47  ;;  %1126 = vrcp.f32 %v1421_v0  ;;  %v1485_v37 = vor.u32 1.1754944e-38, %v637_v13  ;;  %v860_v12 = vand.u32 2147483647, %v1421_v0 }
 0x253   :  { %v649_v8 = vsel %vm641_vm0, %v1359_v17, %v990_v63  ;;  %v711_v17 = vadd.f32 %v1366_v24, %v710_v60  ;;  %v759_v26 = vadd.f32 %v1369_v27, %v758_v4  ;;  %v835_v44 = vmul.f32 1.442695, %v1454_v19 }
 0x254   :  { %901 = vrot.lane.b32.xlu1 %v649_v8, %s1198_s12  ;;  %v725_v18 = vmul.f32 %v1381_v39, %v724_v62  ;;  %vm689_vm0 = vcmp.gt.f32.partialorder %v1395_v48, 0.0  ;;  %vm631_vm9 = vweird.f32 %v1379_v36 }
 0x255   :  { %v1417_v59 = vpop.eup %1122  ;;  %v715_v45 = vsel %vm1475_vm12, %v1366_v24, %v711_v17  ;;  %v763_v35 = vsel %vm1499_vm15, %v1369_v27, %v759_v26  ;;  %vm833_vm12 = vcmp.gt.f32.partialorder %v1454_v19, 0.0 }
 0x256   :  { %v627_v9 = vmul.f32 %v1417_v59, %v1379_v36  ;;  %v726_v42 = vadd.f32 %v1381_v39, %v725_v18  ;;  %v720_v15 = vsel %vm1426_vm6, %v1411_v56, %v715_v45  ;;  %vm632_vm2 = vweird.f32 %v1417_v59  ;;  %vm1534_vm6 = vmor %vm679_vm4, %vm680_vm3 }
 0x257   :  { %v1125_v41 = vpop.eup %1124  ;;  %v1547_v57 = vmul.f32 %v720_v15, %v1312_v34  ;;  %v768_v1 = vsel %vm1459_vm7, %v767_v25, %v763_v35  ;;  %v682_v63 = vsel %vm1534_vm6, %v1364_v23, %v1457_v21  ;;  %vm1573_vm4 = vcmp.eq.f32.partialorder %v635_v33, 8.507059e+37 }
 0x258   :  { %v1446_v14 = vpop.permute.xlu0 %848  ;;  %v1448_v16 = vpop.permute.xlu1 %560  ;;  %v628_v28 = vsub.f32 1.0, %v627_v9  ;;  %v992_v51 = vadd.f32 -1.0, %v1125_v41  ;;  %v730_v58 = vsel %vm1519_vm1, %v1381_v39, %v726_v42  ;;  %v1571_v9 = vmul.f32 %v768_v1, %v1312_v34 }
 0x259   :  { %1128 = vrcp.f32 %v1446_v14  ;;  %v1493_v46 = vpop.eup %1126  ;;  %v875_v49 = vand.u32 2147483647, %v1446_v14  ;;  %v877_v50 = vand.u32 2147483648, %v1446_v14  ;;  %vm871_vm5 = vweird.f32 %v1446_v14 }
 0x25a   :  { %1130 = vrcp.f32 %v1448_v16  ;;  %v629_v24 = vmul.f32 %v1417_v59, %v628_v28  ;;  %v697_v55 = vsel %vm689_vm0, %v1395_v48, %v992_v51  ;;  %v1541_v27 = vmul.f32 %v1493_v46, %v1421_v0  ;;  %vm1626_vm0 = vmor %vm631_vm9, %vm632_vm2 }
 0x25b   :  { %1132 = vpow2.f32 %v835_v44  ;;  %909 = vrot.lane.b32.xlu0 %v697_v55, %s1199_s13  ;;  %vm1562_vm3 = vcmp.eq.f32.partialorder %v875_v49, 8.507059e+37  ;;  %v878_v5 = vor.u32 1.1754944e-38, %v877_v50  ;;  %v587_v39 = vand.u32 2147483647, %v1448_v16 }
 0x25c   :  { %v630_v2 = vadd.f32 %v1417_v59, %v629_v24  ;;  %v589_v4 = vand.u32 2147483648, %v1448_v16  ;;  %v739_v8 = vmul.f32 1.442695, %v1547_v57  ;;  %v735_v11 = vsel %vm1480_vm14, %v734_v32, %v730_v58 }
 0x25d   :  { %v687_v13 = vsel %vm1467_vm11, %v1407_v54, %v682_v63  ;;  %v787_v22 = vmul.f32 1.442695, %v1571_v9  ;;  %v1589_v25 = vmul.f32 %v735_v11, %v1320_v40  ;;  %v853_v54 = vsub.f32 1.0, %v1541_v27 }
 0x25e   :  { %v1592_v26 = vmul.f32 %v687_v13, %v1320_v40  ;;  %vm583_vm13 = vweird.f32 %v1448_v16  ;;  %vm1612_vm15 = vcmp.eq.f32.partialorder %v587_v39, 8.507059e+37  ;;  %v590_v41 = vor.u32 1.1754944e-38, %v589_v4 }
 0x25f   :  { %v1506_v52 = vpop.eup %1128  ;;  %v741_v44 = vmul.f32 1.442695, %v1589_v25  ;;  %v634_v36 = vsel %vm1626_vm0, %v1417_v59, %v630_v2  ;;  %vm856_vm2 = vweird.f32 %v1421_v0  ;;  %v854_v58 = vmul.f32 %v1493_v46, %v853_v54 }
 0x260   :  { %v867_v38 = vmul.f32 %v1506_v52, %v1446_v14  ;;  %v1528_v56 = vpop.eup %1130  ;;  %vm872_vm7 = vweird.f32 %v1506_v52  ;;  %v693_v45 = vmul.f32 1.442695, %v1592_v26  ;;  %v639_v55 = vsel %vm1573_vm4, %v1485_v37, %v634_v36 }
 0x261   :  { %v1544_v48 = vpop.permute.xlu1 %752  ;;  %v579_v62 = vmul.f32 %v1528_v56, %v1448_v16  ;;  %v1133_v23 = vpop.eup %1132  ;;  %vm584_vm10 = vweird.f32 %v1528_v56  ;;  %vm1599_vm11 = vmor %vm871_vm5, %vm872_vm7  ;;  %vm737_vm5 = vcmp.gt.f32.partialorder %v1547_v57, 0.0  ;;  %v1664_v1 = vmul.f32 %v639_v55, %v1320_v40 }
 0x262   :  { %v868_v60 = vsub.f32 1.0, %v867_v38  ;;  %1134 = vrcp.f32 %v1544_v48  ;;  %v998_v21 = vadd.f32 -1.0, %v1133_v23  ;;  %vm1608_vm14 = vmor %vm583_vm13, %vm584_vm10  ;;  %v779_v50 = vand.u32 2147483647, %v1544_v48 }
 0x263   :  { %v580_v7 = vsub.f32 1.0, %v579_v62  ;;  %1136 = vpow2.f32 %v739_v8  ;;  %vm775_vm6 = vweird.f32 %v1544_v48  ;;  %vm785_vm4 = vcmp.gt.f32.partialorder %v1571_v9, 0.0 }
 0x264   :  { %v869_v6 = vmul.f32 %v1506_v52, %v868_v60  ;;  %v841_v31 = vsel %vm833_vm12, %v1454_v19, %v998_v21  ;;  %1138 = vpow2.f32 %v787_v22  ;;  %v862_v8 = vand.u32 2147483648, %v1421_v0 }
 0x265   :  { %v581_v18 = vmul.f32 %v1528_v56, %v580_v7  ;;  %933 = vrot.lane.b32.xlu0 %v841_v31, %s1200_s14  ;;  %v855_v11 = vadd.f32 %v1493_v46, %v854_v58  ;;  %vm857_vm7 = vweird.f32 %v1493_v46  ;;  %vm738_vm10 = vcmp.gt.f32.partialorder %v1589_v25, 0.0 }
 0x266   :  { %v870_v17 = vadd.f32 %v1506_v52, %v869_v6  ;;  %v645_v6 = vmul.f32 1.442695, %v1664_v1  ;;  %vm1703_vm13 = vcmp.eq.f32.partialorder %v860_v12, 8.507059e+37 }
 0x267   :  { %v582_v30 = vadd.f32 %v1528_v56, %v581_v18 }
 0x268   :  { %v1594_v28 = vpop.eup %1134  ;;  %v874_v16 = vsel %vm1599_vm11, %v1506_v52, %v870_v17  ;;  %v781_v52 = vand.u32 2147483648, %v1544_v48  ;;  %vm1697_vm11 = vmor %vm856_vm2, %vm857_vm7 }
 0x269   :  { %v771_v14 = vmul.f32 %v1594_v28, %v1544_v48  ;;  %v586_v47 = vsel %vm1608_vm14, %v1528_v56, %v582_v30  ;;  %v1137_v51 = vpop.eup %1136  ;;  %v879_v15 = vsel %vm1562_vm3, %v878_v5, %v874_v16  ;;  %vm776_vm1 = vweird.f32 %v1594_v28 }
 0x26a   :  { %v1630_v42 = vpop.permute.xlu1 %800  ;;  %v591_v24 = vsel %vm1612_vm15, %v590_v41, %v586_v47  ;;  %v994_v53 = vadd.f32 -1.0, %v1137_v51  ;;  %v1655_v38 = vmul.f32 %v879_v15, %v1320_v40  ;;  %v1139_v56 = vpop.eup %1138  ;;  %vm1667_vm9 = vmor %vm775_vm6, %vm776_vm1  ;;  %vm1671_vm3 = vcmp.eq.f32.partialorder %v779_v50, 8.507059e+37 }
 0x26b   :  { %v772_v49 = vsub.f32 1.0, %v771_v14  ;;  %1140 = vrcp.f32 %v1630_v42  ;;  %v1652_v59 = vmul.f32 %v591_v24, %v1320_v40  ;;  %v996_v37 = vadd.f32 -1.0, %v1139_v56 }
 0x26c   :  { %1142 = vpow2.f32 %v741_v44  ;;  %v745_v27 = vsel %vm737_vm5, %v1547_v57, %v994_v53  ;;  %v782_v57 = vor.u32 1.1754944e-38, %v781_v52  ;;  %v885_v2 = vmul.f32 1.442695, %v1655_v38 }
 0x26d   :  { %v773_v35 = vmul.f32 %v1594_v28, %v772_v49  ;;  %1144 = vpow2.f32 %v693_v45  ;;  %917 = vrot.lane.b32.xlu2 %v745_v27, %s1201_s15  ;;  %v597_v48 = vmul.f32 1.442695, %v1652_v59  ;;  %v793_v39 = vsel %vm785_vm4, %v1571_v9, %v996_v37 }
 0x26e   :  { %925 = vrot.lane.b32.xlu1 %v793_v39, %s1202_s16  ;;  %v827_v13 = vand.u32 2147483647, %v1630_v42  ;;  %v829_v17 = vand.u32 2147483648, %v1630_v42  ;;  %v863_v30 = vor.u32 1.1754944e-38, %v862_v8  ;;  %vm823_vm14 = vweird.f32 %v1630_v42 }
 0x26f   :  { %v774_v20 = vadd.f32 %v1594_v28, %v773_v35  ;;  %1146 = vpow2.f32 %v597_v48  ;;  %vm690_vm15 = vcmp.gt.f32.partialorder %v1592_v26, 0.0  ;;  %v859_v32 = vsel %vm1697_vm11, %v1493_v46, %v855_v11 }
 0x270   :  { %1148 = vpow2.f32 %v885_v2  ;;  %vm828_vm1 = vcmp.eq.f32.partialorder %v827_v13, 8.507059e+37  ;;  %v830_v0 = vor.u32 1.1754944e-38, %v829_v17  ;;  %vm594_vm2 = vcmp.gt.f32.partialorder %v1652_v59, 0.0 }
 0x271   :  { %v1141_v63 = vpop.eup %1140  ;;  %v778_v3 = vsel %vm1667_vm9, %v1594_v28, %v774_v20  ;;  %1150 = vpow2.f32 %v645_v6  ;;  %vm882_vm5 = vcmp.gt.f32.partialorder %v1655_v38, 0.0  ;;  %v864_v44 = vsel %vm1703_vm13, %v863_v30, %v859_v32 }
 0x272   :  { %v1143_v5 = vpop.eup %1142  ;;  %v819_v4 = vmul.f32 %v1141_v63, %v1630_v42  ;;  %v783_v10 = vsel %vm1671_vm3, %v782_v57, %v778_v3  ;;  %vm824_vm12 = vweird.f32 %v1141_v63  ;;  %v865_v50 = vmul.f32 %v864_v44, %v1312_v34 }
 0x273   :  { %v1145_v7 = vpop.eup %1144  ;;  %v995_v23 = vadd.f32 -1.0, %v1143_v5  ;;  %v784_v28 = vmul.f32 %v783_v10, %v1320_v40  ;;  %vm825_vm0 = vmor %vm823_vm14, %vm824_vm12  ;;  %vm642_vm6 = vcmp.gt.f32.partialorder %v1664_v1, 0.0  ;;  %v526_v48 = vand.u32 2147483648, %v1336_v61 }
 0x274   :  { %v820_v9 = vsub.f32 1.0, %v819_v4  ;;  %v993_v22 = vadd.f32 -1.0, %v1145_v7  ;;  %v883_v51 = vmul.f32 1.442695, %v865_v50  ;;  %vm881_vm4 = vcmp.gt.f32.partialorder %v865_v50, 0.0 }
 0x275   :  { %v746_v18 = vsel %vm738_vm10, %v1589_v25, %v995_v23  ;;  %v1147_v25 = vpop.eup %1146  ;;  %v789_v19 = vmul.f32 1.442695, %v784_v28  ;;  %vm786_vm3 = vcmp.gt.f32.partialorder %v784_v28, 0.0  ;;  %vm520_vm10 = vweird.f32 %v1336_v61 }
 0x276   :  { %v821_v21 = vmul.f32 %v1141_v63, %v820_v9  ;;  %919 = vrot.lane.b32.xlu0 %v746_v18, %s1201_s15  ;;  %v1149_v33 = vpop.eup %1148  ;;  %v989_v12 = vadd.f32 -1.0, %v1147_v25  ;;  %v698_v14 = vsel %vm690_vm15, %v1592_v26, %v993_v22  ;;  %v527_v3 = vor.u32 1.1754944e-38, %v526_v48 }
 0x277   :  { %v1001_v16 = vadd.f32 -1.0, %v1149_v33  ;;  %911 = vrot.lane.b32.xlu1 %v698_v14, %s1199_s13  ;;  %v1151_v45 = vpop.eup %1150  ;;  %1152 = vpow2.f32 %v789_v19  ;;  %v541_v10 = vand.u32 2147483648, %v1386_v43  ;;  %vm535_vm14 = vweird.f32 %v1386_v43 }
 0x278   :  { %v822_v31 = vadd.f32 %v1141_v63, %v821_v21  ;;  %v602_v42 = vsel %vm594_vm2, %v1652_v59, %v989_v12  ;;  %v991_v36 = vadd.f32 -1.0, %v1151_v45 }
 0x279   :  { %895 = vrot.lane.b32.xlu2 %v602_v42, %s1197_s11  ;;  %v890_v47 = vsel %vm882_vm5, %v1655_v38, %v1001_v16  ;;  %v542_v17 = vor.u32 1.1754944e-38, %v541_v10  ;;  %vm952_vm5 = vcmask 195584  }
 0x27a   :  { %v826_v41 = vsel %vm825_vm0, %v1141_v63, %v822_v31  ;;  %v650_v52 = vsel %vm642_vm6, %v1664_v1, %v991_v36  ;;  %v524_v63 = vand.u32 2147483647, %v1336_v61  ;;  %vm955_vm6 = vcmask 261120  }
 0x27b   :  { %v831_v46 = vsel %vm828_vm1, %v830_v0, %v826_v41  ;;  %vm947_vm1 = vcmask 64512  }
 0x27c   :  { %v832_v26 = vmul.f32 %v831_v46, %v1320_v40  ;;  %vm525_vm11 = vcmp.eq.f32.partialorder %v524_v63, 8.507059e+37 }
 0x27d   :  { %v1153_v24 = vpop.eup %1152 }
 0x27e   :  { %943 = vrot.lane.b32.xlu0 %v890_v47, %s1203_s17  ;;  %v837_v49 = vmul.f32 1.442695, %v832_v26  ;;  %v997_v35 = vadd.f32 -1.0, %v1153_v24  ;;  %vm834_vm9 = vcmp.gt.f32.partialorder %v832_v26, 0.0 }
 0x280   :  { %1154 = vpow2.f32 %v837_v49  ;;  %v794_v38 = vsel %vm786_vm3, %v784_v28, %v997_v35  ;;  %vm961_vm3 = vcmask 392192  }
 0x281   :  { %903 = vrot.lane.b32.xlu2 %v650_v52, %s1198_s12  ;;  %1156 = vpow2.f32 %v883_v51 }
 0x282   :  { %1158 = vrcp.f32 %v1336_v61 }
 0x283   :  { %1160 = vrcp.f32 %v1386_v43 }
 0x286   :  { %v1155_v15 = vpop.eup %1154 }
 0x287   :  { %v999_v53 = vadd.f32 -1.0, %v1155_v15  ;;  %v1157_v55 = vpop.eup %1156 }
 0x288   :  { %v1000_v56 = vadd.f32 -1.0, %v1157_v55  ;;  %v1159_v27 = vpop.eup %1158 }
 0x289   :  { %v842_v59 = vsel %vm834_vm9, %v832_v26, %v999_v53  ;;  %927 = vrot.lane.b32.xlu2 %v794_v38, %s1202_s16  ;;  %v516_v1 = vmul.f32 %v1159_v27, %v1336_v61  ;;  %v1161_v62 = vpop.eup %1160  ;;  %vm521_vm7 = vweird.f32 %v1159_v27  ;;  %v539_v61 = vand.u32 2147483647, %v1386_v43 }
 0x28a   :  { %935 = vrot.lane.b32.xlu1 %v842_v59, %s1200_s14  ;;  %v889_v20 = vsel %vm881_vm4, %v865_v50, %v1000_v56  ;;  %vm522_vm12 = vmor %vm520_vm10, %vm521_vm7  ;;  %v531_v57 = vmul.f32 %v1161_v62, %v1386_v43  ;;  %vm536_vm13 = vweird.f32 %v1161_v62  ;;  %vm958_vm9 = vcmask 326656  }
 0x28b   :  { %v517_v58 = vsub.f32 1.0, %v516_v1  ;;  %vm537_vm15 = vmor %vm535_vm14, %vm536_vm13  ;;  %vm540_vm0 = vcmp.eq.f32.partialorder %v539_v61, 8.507059e+37  ;;  %vm964_vm4 = vcmask 457728   ;;  %vm967_vm7 = vcmask 523264  }
 0x28c   :  { %v532_v5 = vsub.f32 1.0, %v531_v57 }
 0x28d   :  { %v518_v60 = vmul.f32 %v1159_v27, %v517_v58 }
 0x28e   :  { %v533_v7 = vmul.f32 %v1161_v62, %v532_v5 }
 0x28f   :  { %v519_v37 = vadd.f32 %v1159_v27, %v518_v60 }
 0x290   :  { %v534_v23 = vadd.f32 %v1161_v62, %v533_v7 }
 0x291   :  { %941 = vrot.lane.b32.xlu2 %v889_v20, %s1203_s17  ;;  %v523_v2 = vsel %vm522_vm12, %v1159_v27, %v519_v37 }
 0x292   :  { %v528_v39 = vsel %vm525_vm11, %v527_v3, %v523_v2  ;;  %v538_v13 = vsel %vm537_vm15, %v1161_v62, %v534_v23 }
 0x293   :  { %v529_v6 = vmul.f32 %v528_v39, %v1312_v34  ;;  %v543_v18 = vsel %vm540_vm0, %v542_v17, %v538_v13 }
 0x294   :  { %v544_v34 = vmul.f32 %v543_v18, %v1320_v40 }
 0x295   :  { %v547_v8 = vmul.f32 1.442695, %v529_v6  ;;  %vm545_vm2 = vcmp.gt.f32.partialorder %v529_v6, 0.0 }
 0x296   :  { %v549_v30 = vmul.f32 1.442695, %v544_v34  ;;  %vm546_vm10 = vcmp.gt.f32.partialorder %v544_v34, 0.0 }
 0x297   :  { %1162 = vpow2.f32 %v547_v8 }
 0x298   :  { %1164 = vpow2.f32 %v549_v30 }
 0x29d   :  { %v1163_v21 = vpop.eup %1162 }
 0x29e   :  { %v986_v28 = vadd.f32 -1.0, %v1163_v21  ;;  %v1165_v16 = vpop.eup %1164 }
 0x29f   :  { %v987_v42 = vadd.f32 -1.0, %v1165_v16 }
 0x2a0   :  { %v553_v25 = vsel %vm545_vm2, %v529_v6, %v986_v28 }
 0x2a1   :  { %v554_v44 = vsel %vm546_vm10, %v544_v34, %v987_v42 }
 0x2b6   :  { %v894_v11 = vpop.permute.xlu1 %893 }
 0x2b7   :  { %v948_v43 = vsel %vm947_vm1, %v553_v25, %v894_v11 }
 0x2c6   :  { %v902_v54 = vpop.permute.xlu1 %901 }
 0x2c7   :  { %v918_v4 = vpop.permute.xlu2 %917  ;;  %v950_v31 = vsel %vm76_vm8, %v948_v43, %v902_v54 }
 0x2cd   :  { %v910_v29 = vpop.permute.xlu0 %909 }
 0x2ce   :  { %v953_v33 = vsel %vm952_vm5, %v950_v31, %v910_v29 }
 0x2cf   :  { %v956_v0 = vsel %vm955_vm6, %v953_v33, %v918_v4 }
 0x2d3   :  { %v896_v9 = vpop.permute.xlu2 %895 }
 0x2d4   :  { %v949_v47 = vsel %vm947_vm1, %v554_v44, %v896_v9 }
 0x2d7   :  { %v934_v12 = vpop.permute.xlu0 %933 }
 0x2db   :  { %v904_v22 = vpop.permute.xlu2 %903 }
 0x2dc   :  { %v951_v26 = vsel %vm76_vm8, %v949_v47, %v904_v22 }
 0x2e0   :  { %v926_v40 = vpop.permute.xlu1 %925 }
 0x2e1   :  { %v959_v14 = vsel %vm958_vm9, %v956_v0, %v926_v40 }
 0x2e2   :  { %v962_v19 = vsel %vm961_vm3, %v959_v14, %v934_v12 }
 0x2e3   :  { %v928_v32 = vpop.permute.xlu2 %927 }
 0x2e8   :  { %v920_v49 = vpop.permute.xlu0 %919 }
 0x2e9   :  { %v912_v45 = vpop.permute.xlu1 %911 }
 0x2ea   :  { %v954_v50 = vsel %vm952_vm5, %v951_v26, %v912_v45 }
 0x2eb   :  { %v942_v41 = vpop.permute.xlu2 %941  ;;  %v957_v36 = vsel %vm955_vm6, %v954_v50, %v920_v49 }
 0x2ec   :  { %v965_v46 = vsel %vm964_vm4, %v962_v19, %v942_v41  ;;  %v960_v51 = vsel %vm958_vm9, %v957_v36, %v928_v32 }
 0x2ed   :  { %968 = vst.msk [vmem:[%s1767_s4] sm:$0xff] %vm967_vm7, %v965_v46 }
 0x2f0   :  { %v944_v24 = vpop.permute.xlu0 %943 }
 0x2fc   :  { %v936_v52 = vpop.permute.xlu1 %935 }
 0x2fd   :  { %v963_v15 = vsel %vm961_vm3, %v960_v51, %v936_v52 }
 0x2fe   :  { %v966_v35 = vsel %vm964_vm4, %v963_v15, %v944_v24 }
 0x2ff   :  { %969 = vst.msk [vmem:[%s1767_s4 + $0x8] sm:$0xff] %vm967_vm7, %v966_v35 }

</bundles_post_ra>
